<compile_context>
chip_gen: v5e
topology: v5e:2x2
jax: 0.10.0
libtpu: 0.0.40
codegen_flags: <defaults>
</compile_context>

<pallas_src>
import functools
import math

import jax
import jax.numpy as jnp
import numpy as np
from jax import lax
from jax.experimental import pallas as pl
from jax.experimental.pallas import tpu as pltpu


# ---------------------------------------------------------------------------
# Pallas kernel (whole SAINT forward after token embedding)
# ---------------------------------------------------------------------------
def _layernorm(x, g, b, eps=1e-5):
    mu = jnp.mean(x, axis=-1, keepdims=True)
    var = jnp.mean((x - mu) ** 2, axis=-1, keepdims=True)
    return (x - mu) * jax.lax.rsqrt(var + eps) * g + b


def saint_fused_kernel(
    x_ref,        # (N, D)    tokens, position-major rows: r = s*B + b
    hmask_ref,    # (H, 1, D) 1.0 on head h's lanes, else 0.0
    bmask_ref,    # (N, N)    additive mask: 0 same sample, -1e9 cross sample
    wqkvo_ref,    # (L, 4, D, D)  [Wq, Wk, Wv, Wo] stored (in, out)
    vecs_ref,     # (L, 9, D)     [bq, bk, bv, bo, g1, be1, g2, be2, bf2]
    wf1_ref,      # (L, D, 4D)
    bf1_ref,      # (L, 1, 4D)
    wf2_ref,      # (L, 4D, D)
    w1c_ref,      # (S, D, 2D)  classifier layer 1, split per token position
    b1c_ref,      # (1, 2D)
    w2c_ref,      # (2D, D)
    b2c_ref,      # (1, D)
    w3c_ref,      # (D, C)
    b3c_ref,      # (1, C)
    out_ref,      # (B, C)
    *, n_heads, seq_len, batch,
):
    N, D = x_ref.shape
    d_k = D // n_heads
    n_layers = wqkvo_ref.shape[0]
    scale = 1.0 / math.sqrt(d_k)

    x = x_ref[...]                 # (N, D), stays resident in VMEM/vregs
    hmask = hmask_ref[...]         # (H, 1, D)
    bmask = bmask_ref[...]         # (N, N)

    for l in range(n_layers):      # static unroll; all weights fit VMEM
        vec = vecs_ref[l]          # (9, D)
        bq, bk, bv, bo = vec[0:1], vec[1:2], vec[2:3], vec[3:4]
        g1, be1, g2, be2, bf2 = vec[4:5], vec[5:6], vec[6:7], vec[7:8], vec[8:9]

        # --- attention: QKV as single (N,D)x(D,D) MXU matmuls -------------
        q = jnp.dot(x, wqkvo_ref[l, 0], preferred_element_type=jnp.float32) + bq
        k = jnp.dot(x, wqkvo_ref[l, 1], preferred_element_type=jnp.float32) + bk
        v = jnp.dot(x, wqkvo_ref[l, 2], preferred_element_type=jnp.float32) + bv

        # per-head restriction via lane masks (no slicing / concatenation)
        qh = q[None, :, :] * hmask             # (H, N, D)
        kh = k[None, :, :] * hmask             # (H, N, D)
        vh = v[None, :, :] * hmask             # (H, N, D)

        # scores for all heads and the whole batch at once (head = batch dim)
        s = lax.dot_general(qh, kh, (((2,), (2,)), ((0,), (0,))),
                            preferred_element_type=jnp.float32)    # (H, N, N)
        s = s * scale + bmask[None, :, :]
        s = s - jnp.max(s, axis=-1, keepdims=True)
        p = jnp.exp(s)
        p = p / jnp.sum(p, axis=-1, keepdims=True)

        o = lax.dot_general(p, vh, (((2,), (1,)), ((0,), (0,))),
                            preferred_element_type=jnp.float32)    # (H, N, D)
        attn = jnp.sum(o, axis=0)                                   # (N, D)
        attn = jnp.dot(attn, wqkvo_ref[l, 3],
                       preferred_element_type=jnp.float32) + bo

        h1 = _layernorm(x + attn, g1, be1)

        # --- feed-forward --------------------------------------------------
        ff = jnp.maximum(
            jnp.dot(h1, wf1_ref[l], preferred_element_type=jnp.float32)
            + bf1_ref[l], 0.0)
        ff = jnp.dot(ff, wf2_ref[l], preferred_element_type=jnp.float32) + bf2

        x = _layernorm(h1 + ff, g2, be2)

    # --- classifier head ---------------------------------------------------
    # per-sample flatten realised as a sum of per-position matmuls:
    # rows of position s are the contiguous slice [s*B, (s+1)*B).
    e1 = w1c_ref.shape[2]
    hc = jnp.zeros((batch, e1), jnp.float32)
    for s_pos in range(seq_len):
        xs = x[s_pos * batch:(s_pos + 1) * batch, :]                # (B, D)
        hc = hc + jnp.dot(xs, w1c_ref[s_pos],
                          preferred_element_type=jnp.float32)
    hc = jnp.maximum(hc + b1c_ref[...], 0.0)
    hc = jnp.maximum(
        jnp.dot(hc, w2c_ref[...], preferred_element_type=jnp.float32)
        + b2c_ref[...], 0.0)
    out_ref[...] = (
        jnp.dot(hc, w3c_ref[...], preferred_element_type=jnp.float32)
        + b3c_ref[...])


# ---------------------------------------------------------------------------
# Wrapper: token embedding (glue) + single fused pallas_call
# ---------------------------------------------------------------------------
def saint_forward(params, numerical, categorical, n_heads):
    # token embedding: scalar projection, embedding gathers, positional enc.
    # TODO(synk): embedding gathers stay in JAX glue (dynamic gather).
    num_tok = (numerical[:, :, None] * params["num_proj_w"][None, None, :]
               + params["num_proj_b"][None, None, :])                 # (B, n_num, D)
    cat_tok = jnp.stack(
        [params["cat_emb"][i][categorical[:, i]]
         for i in range(categorical.shape[1])], axis=1)               # (B, n_cat, D)
    x = jnp.concatenate([num_tok, cat_tok], axis=1)                   # (B, S, D)
    x = x + params["pos_enc"][:, :x.shape[1], :]

    B, S, D = x.shape
    H = n_heads
    d_k = D // H
    N = S * B

    # position-major row layout: row r = s*B + b
    x2d = jnp.transpose(x, (1, 0, 2)).reshape(N, D)

    # static masks (tiny constants)
    hmask = (jnp.arange(H)[:, None, None]
             == (jnp.arange(D)[None, None, :] // d_k)).astype(jnp.float32)
    r_batch = jnp.arange(N) % B
    bmask = jnp.where(r_batch[:, None] == r_batch[None, :],
                      0.0, -1e9).astype(jnp.float32)

    # packed per-layer weights
    layers = params["layers"]
    wqkvo = jnp.stack(
        [jnp.stack([p["wq"], p["wk"], p["wv"], p["wo"]]) for p in layers])
    vecs = jnp.stack([jnp.concatenate(
        [p["bq"], p["bk"], p["bv"], p["bo"],
         p["g1"], p["be1"], p["g2"], p["be2"], p["bf2"]], axis=0)
        for p in layers])
    wf1 = jnp.stack([p["wf1"] for p in layers])
    bf1 = jnp.stack([p["bf1"] for p in layers])
    wf2 = jnp.stack([p["wf2"] for p in layers])

    c = params["cls"]
    w1c = c["w1"].reshape(S, D, c["w1"].shape[1])   # (S, D, 2D)
    C = c["w3"].shape[1]

    kernel = functools.partial(saint_fused_kernel,
                               n_heads=H, seq_len=S, batch=B)
    return pl.pallas_call(
        kernel,
        out_shape=jax.ShapeDtypeStruct((B, C), jnp.float32),
        # single invocation: every operand is a full-array VMEM block
        # (no grid -> no per-step pipelining overhead / double buffers)
        compiler_params=pltpu.CompilerParams(vmem_limit_bytes=32 * 1024 * 1024),
    )(x2d, hmask, bmask, wqkvo, vecs, wf1, bf1, wf2,
      w1c, c["b1"], c["w2"], c["b2"], c["w3"], c["b3"])


# ---------------------------------------------------------------------------
# Parameter initialization (deterministic, synthetic)
# ---------------------------------------------------------------------------
def init_params(key, num_num, cat_info, d_model, n_heads, n_layers, num_classes):
    keys = iter(jax.random.split(key, 256))

    def rnd(shape, scale=0.05):
        return scale * jax.random.normal(next(keys), shape, dtype=jnp.float32)

    max_features = num_num + len(cat_info)
    params = {
        "num_proj_w": rnd((d_model,)),   # Linear(1, d_model) weight (flattened)
        "num_proj_b": rnd((d_model,)),
        "cat_emb": [rnd((n_cat, d_model)) for _, n_cat in cat_info],
        "pos_enc": rnd((1, max_features, d_model)),
        "layers": [],
    }
    for _ in range(n_layers):
        layer = {
            "wq": rnd((d_model, d_model)), "bq": rnd((1, d_model)),
            "wk": rnd((d_model, d_model)), "bk": rnd((1, d_model)),
            "wv": rnd((d_model, d_model)), "bv": rnd((1, d_model)),
            "wo": rnd((d_model, d_model)), "bo": rnd((1, d_model)),
            "g1": jnp.ones((1, d_model), jnp.float32),
            "be1": jnp.zeros((1, d_model), jnp.float32),
            "wf1": rnd((d_model, 4 * d_model)), "bf1": rnd((1, 4 * d_model)),
            "wf2": rnd((4 * d_model, d_model)), "bf2": rnd((1, d_model)),
            "g2": jnp.ones((1, d_model), jnp.float32),
            "be2": jnp.zeros((1, d_model), jnp.float32),
        }
        params["layers"].append(layer)
    flat = d_model * max_features
    params["cls"] = {
        "w1": rnd((flat, 2 * d_model)), "b1": rnd((1, 2 * d_model)),
        "w2": rnd((2 * d_model, d_model)), "b2": rnd((1, d_model)),
        "w3": rnd((d_model, num_classes)), "b3": rnd((1, num_classes)),
    }
    return params


# ---------------------------------------------------------------------------
# Pure-JAX reference (for correctness check)
# ---------------------------------------------------------------------------
def ref_forward(params, numerical, categorical, n_heads):
    num_tok = (numerical[:, :, None] * params["num_proj_w"][None, None, :]
               + params["num_proj_b"][None, None, :])
    cat_tok = jnp.stack(
        [params["cat_emb"][i][categorical[:, i]]
         for i in range(categorical.shape[1])], axis=1)
    x = jnp.concatenate([num_tok, cat_tok], axis=1)
    x = x + params["pos_enc"][:, :x.shape[1], :]
    B, S, D = x.shape
    d_k = D // n_heads
    for p in params["layers"]:
        q = (x @ p["wq"] + p["bq"]).reshape(B, S, n_heads, d_k).transpose(0, 2, 1, 3)
        k = (x @ p["wk"] + p["bk"]).reshape(B, S, n_heads, d_k).transpose(0, 2, 1, 3)
        v = (x @ p["wv"] + p["bv"]).reshape(B, S, n_heads, d_k).transpose(0, 2, 1, 3)
        s = jnp.einsum("bhqd,bhkd->bhqk", q, k) / math.sqrt(d_k)
        a = jax.nn.softmax(s, axis=-1)
        o = jnp.einsum("bhqk,bhkd->bhqd", a, v).transpose(0, 2, 1, 3).reshape(B, S, D)
        o = o @ p["wo"] + p["bo"]
        x = _layernorm(x + o, p["g1"], p["be1"])
        f = jnp.maximum(x @ p["wf1"] + p["bf1"], 0.0) @ p["wf2"] + p["bf2"]
        x = _layernorm(x + f, p["g2"], p["be2"])
    xf = x.reshape(B, -1)
    c = params["cls"]
    h = jnp.maximum(xf @ c["w1"] + c["b1"], 0.0)
    h = jnp.maximum(h @ c["w2"] + c["b2"], 0.0)
    return h @ c["w3"] + c["b3"]


# ---------------------------------------------------------------------------
if __name__ == "__main__":
    B = 2
    num_numerical_features = 3
    categorical_features_info = [("c0", 5), ("c1", 7)]
    d_model = 32
    n_heads = 4
    n_layers = 2
    num_classes = 2

    key = jax.random.PRNGKey(0)
    k_param, k_num, k_cat = jax.random.split(key, 3)

    params = init_params(
        k_param, num_numerical_features, categorical_features_info,
        d_model, n_heads, n_layers, num_classes,
    )

    numerical = jax.random.normal(k_num, (B, num_numerical_features), dtype=jnp.float32)
    categorical = jnp.stack(
        [
            jax.random.randint(jax.random.fold_in(k_cat, i), (B,), 0, n_cat)
            for i, (_, n_cat) in enumerate(categorical_features_info)
        ],
        axis=1,
    ).astype(jnp.int32)

    fwd = jax.jit(functools.partial(saint_forward, n_heads=n_heads))
    out = fwd(params, numerical, categorical)
    out = jax.block_until_ready(out)

    ref = ref_forward(params, numerical, categorical, n_heads)
    np.testing.assert_allclose(np.asarray(out), np.asarray(ref), atol=1e-4, rtol=1e-4)

    print("KERNEL_OK")
</pallas_src>

<mosaic_0001>
module attributes {stable_mosaic.version = 11 : i64} {
  func.func @saint_fused_kernel(%arg0: memref<10x32xf32, #tpu.memory_space<vmem>>, %arg1: memref<4x1x32xf32, #tpu.memory_space<vmem>>, %arg2: memref<10x10xf32, #tpu.memory_space<vmem>>, %arg3: memref<2x4x32x32xf32, #tpu.memory_space<vmem>>, %arg4: memref<2x9x32xf32, #tpu.memory_space<vmem>>, %arg5: memref<2x32x128xf32, #tpu.memory_space<vmem>>, %arg6: memref<2x1x128xf32, #tpu.memory_space<vmem>>, %arg7: memref<2x128x32xf32, #tpu.memory_space<vmem>>, %arg8: memref<5x32x64xf32, #tpu.memory_space<vmem>>, %arg9: memref<1x64xf32, #tpu.memory_space<vmem>>, %arg10: memref<64x32xf32, #tpu.memory_space<vmem>>, %arg11: memref<1x32xf32, #tpu.memory_space<vmem>>, %arg12: memref<32x2xf32, #tpu.memory_space<vmem>>, %arg13: memref<1x2xf32, #tpu.memory_space<vmem>>, %arg14: memref<2x2xf32, #tpu.memory_space<vmem>>) attributes {dimension_semantics = [], scalar_prefetch = 0 : i64, scratch_operands = 0 : i64, tpu.core_type = #tpu.core_type<tc>} {
    %c0 = arith.constant 0 : index
    %c0_0 = arith.constant 0 : index
    %0 = vector.load %arg0[%c0, %c0_0] : memref<10x32xf32, #tpu.memory_space<vmem>>, vector<10x32xf32>
    %c0_1 = arith.constant 0 : index
    %c0_2 = arith.constant 0 : index
    %c0_3 = arith.constant 0 : index
    %1 = vector.load %arg1[%c0_1, %c0_2, %c0_3] : memref<4x1x32xf32, #tpu.memory_space<vmem>>, vector<4x1x32xf32>
    %c0_4 = arith.constant 0 : index
    %c0_5 = arith.constant 0 : index
    %2 = vector.load %arg2[%c0_4, %c0_5] : memref<10x10xf32, #tpu.memory_space<vmem>>, vector<10x10xf32>
    %c0_6 = arith.constant 0 : index
    %c0_7 = arith.constant 0 : index
    %c0_8 = arith.constant 0 : index
    %3 = vector.load %arg4[%c0_6, %c0_7, %c0_8] : memref<2x9x32xf32, #tpu.memory_space<vmem>>, vector<1x9x32xf32>
    %4 = vector.shape_cast %3 : vector<1x9x32xf32> to vector<9x32xf32>
    %5 = vector.extract_strided_slice %4 {offsets = [0, 0], sizes = [1, 32], strides = [1, 1]} : vector<9x32xf32> to vector<1x32xf32>
    %6 = vector.extract_strided_slice %4 {offsets = [1, 0], sizes = [1, 32], strides = [1, 1]} : vector<9x32xf32> to vector<1x32xf32>
    %7 = vector.extract_strided_slice %4 {offsets = [2, 0], sizes = [1, 32], strides = [1, 1]} : vector<9x32xf32> to vector<1x32xf32>
    %8 = vector.extract_strided_slice %4 {offsets = [3, 0], sizes = [1, 32], strides = [1, 1]} : vector<9x32xf32> to vector<1x32xf32>
    %9 = vector.extract_strided_slice %4 {offsets = [4, 0], sizes = [1, 32], strides = [1, 1]} : vector<9x32xf32> to vector<1x32xf32>
    %10 = vector.extract_strided_slice %4 {offsets = [5, 0], sizes = [1, 32], strides = [1, 1]} : vector<9x32xf32> to vector<1x32xf32>
    %11 = vector.extract_strided_slice %4 {offsets = [6, 0], sizes = [1, 32], strides = [1, 1]} : vector<9x32xf32> to vector<1x32xf32>
    %12 = vector.extract_strided_slice %4 {offsets = [7, 0], sizes = [1, 32], strides = [1, 1]} : vector<9x32xf32> to vector<1x32xf32>
    %13 = vector.extract_strided_slice %4 {offsets = [8, 0], sizes = [1, 32], strides = [1, 1]} : vector<9x32xf32> to vector<1x32xf32>
    %c0_9 = arith.constant 0 : index
    %c0_10 = arith.constant 0 : index
    %c0_11 = arith.constant 0 : index
    %c0_12 = arith.constant 0 : index
    %14 = vector.load %arg3[%c0_9, %c0_10, %c0_11, %c0_12] : memref<2x4x32x32xf32, #tpu.memory_space<vmem>>, vector<1x1x32x32xf32>
    %15 = vector.shape_cast %14 : vector<1x1x32x32xf32> to vector<32x32xf32>
    %cst = arith.constant dense<0.000000e+00> : vector<10x32xf32>
    %16 = tpu.matmul %0, %15, %cst {dimension_numbers = #tpu.dot_dimension_numbers<[1], [0], [0], [1], [0, 0, 1, 1], [], []>} : vector<10x32xf32>, vector<32x32xf32>, vector<10x32xf32> -> vector<10x32xf32>
    %17 = vector.broadcast %5 : vector<1x32xf32> to vector<10x32xf32>
    %18 = arith.addf %16, %17 : vector<10x32xf32>
    %c0_13 = arith.constant 0 : index
    %c1 = arith.constant 1 : index
    %c0_14 = arith.constant 0 : index
    %c0_15 = arith.constant 0 : index
    %19 = vector.load %arg3[%c0_13, %c1, %c0_14, %c0_15] : memref<2x4x32x32xf32, #tpu.memory_space<vmem>>, vector<1x1x32x32xf32>
    %20 = vector.shape_cast %19 : vector<1x1x32x32xf32> to vector<32x32xf32>
    %cst_16 = arith.constant dense<0.000000e+00> : vector<10x32xf32>
    %21 = tpu.matmul %0, %20, %cst_16 {dimension_numbers = #tpu.dot_dimension_numbers<[1], [0], [0], [1], [0, 0, 1, 1], [], []>} : vector<10x32xf32>, vector<32x32xf32>, vector<10x32xf32> -> vector<10x32xf32>
    %22 = vector.broadcast %6 : vector<1x32xf32> to vector<10x32xf32>
    %23 = arith.addf %21, %22 : vector<10x32xf32>
    %c0_17 = arith.constant 0 : index
    %c2 = arith.constant 2 : index
    %c0_18 = arith.constant 0 : index
    %c0_19 = arith.constant 0 : index
    %24 = vector.load %arg3[%c0_17, %c2, %c0_18, %c0_19] : memref<2x4x32x32xf32, #tpu.memory_space<vmem>>, vector<1x1x32x32xf32>
    %25 = vector.shape_cast %24 : vector<1x1x32x32xf32> to vector<32x32xf32>
    %cst_20 = arith.constant dense<0.000000e+00> : vector<10x32xf32>
    %26 = tpu.matmul %0, %25, %cst_20 {dimension_numbers = #tpu.dot_dimension_numbers<[1], [0], [0], [1], [0, 0, 1, 1], [], []>} : vector<10x32xf32>, vector<32x32xf32>, vector<10x32xf32> -> vector<10x32xf32>
    %27 = vector.broadcast %7 : vector<1x32xf32> to vector<10x32xf32>
    %28 = arith.addf %26, %27 : vector<10x32xf32>
    %29 = vector.shape_cast %18 : vector<10x32xf32> to vector<1x10x32xf32>
    %30 = vector.broadcast %29 : vector<1x10x32xf32> to vector<4x10x32xf32>
    %31 = vector.broadcast %1 : vector<4x1x32xf32> to vector<4x10x32xf32>
    %32 = arith.mulf %30, %31 : vector<4x10x32xf32>
    %33 = vector.shape_cast %23 : vector<10x32xf32> to vector<1x10x32xf32>
    %34 = vector.broadcast %33 : vector<1x10x32xf32> to vector<4x10x32xf32>
    %35 = vector.broadcast %1 : vector<4x1x32xf32> to vector<4x10x32xf32>
    %36 = arith.mulf %34, %35 : vector<4x10x32xf32>
    %37 = vector.shape_cast %28 : vector<10x32xf32> to vector<1x10x32xf32>
    %38 = vector.broadcast %37 : vector<1x10x32xf32> to vector<4x10x32xf32>
    %39 = vector.broadcast %1 : vector<4x1x32xf32> to vector<4x10x32xf32>
    %40 = arith.mulf %38, %39 : vector<4x10x32xf32>
    %cst_21 = arith.constant dense<0.000000e+00> : vector<4x10x10xf32>
    %41 = tpu.matmul %32, %36, %cst_21 {dimension_numbers = #tpu.dot_dimension_numbers<[2], [2], [1], [1], [0, 0, 0, 1, 1, 1], [0], [0]>} : vector<4x10x32xf32>, vector<4x10x32xf32>, vector<4x10x10xf32> -> vector<4x10x10xf32>
    %cst_22 = arith.constant 0.353553385 : f32
    %42 = vector.broadcast %cst_22 : f32 to vector<4x10x10xf32>
    %43 = arith.mulf %41, %42 : vector<4x10x10xf32>
    %44 = vector.shape_cast %2 : vector<10x10xf32> to vector<1x10x10xf32>
    %45 = vector.broadcast %44 : vector<1x10x10xf32> to vector<4x10x10xf32>
    %46 = arith.addf %43, %45 : vector<4x10x10xf32>
    %cst_23 = arith.constant dense<0xFF800000> : vector<4x10xf32>
    %47 = vector.multi_reduction <maximumf>, %46, %cst_23 [2] : vector<4x10x10xf32> to vector<4x10xf32>
    %48 = vector.shape_cast %47 : vector<4x10xf32> to vector<4x10x1xf32>
    %49 = vector.broadcast %48 : vector<4x10x1xf32> to vector<4x10x10xf32>
    %50 = arith.subf %46, %49 : vector<4x10x10xf32>
    %51 = math.exp %50 : vector<4x10x10xf32>
    %cst_24 = arith.constant dense<0.000000e+00> : vector<4x10xf32>
    %52 = vector.multi_reduction <add>, %51, %cst_24 [2] : vector<4x10x10xf32> to vector<4x10xf32>
    %53 = vector.shape_cast %52 : vector<4x10xf32> to vector<4x10x1xf32>
    %54 = vector.broadcast %53 : vector<4x10x1xf32> to vector<4x10x10xf32>
    %55 = arith.divf %51, %54 : vector<4x10x10xf32>
    %cst_25 = arith.constant dense<0.000000e+00> : vector<4x10x32xf32>
    %56 = tpu.matmul %55, %40, %cst_25 {dimension_numbers = #tpu.dot_dimension_numbers<[2], [1], [1], [2], [0, 0, 0, 1, 1, 2], [0], [0]>} : vector<4x10x10xf32>, vector<4x10x32xf32>, vector<4x10x32xf32> -> vector<4x10x32xf32>
    %cst_26 = arith.constant dense<0.000000e+00> : vector<10x32xf32>
    %57 = vector.multi_reduction <add>, %56, %cst_26 [0] : vector<4x10x32xf32> to vector<10x32xf32>
    %c0_27 = arith.constant 0 : index
    %c3 = arith.constant 3 : index
    %c0_28 = arith.constant 0 : index
    %c0_29 = arith.constant 0 : index
    %58 = vector.load %arg3[%c0_27, %c3, %c0_28, %c0_29] : memref<2x4x32x32xf32, #tpu.memory_space<vmem>>, vector<1x1x32x32xf32>
    %59 = vector.shape_cast %58 : vector<1x1x32x32xf32> to vector<32x32xf32>
    %cst_30 = arith.constant dense<0.000000e+00> : vector<10x32xf32>
    %60 = tpu.matmul %57, %59, %cst_30 {dimension_numbers = #tpu.dot_dimension_numbers<[1], [0], [0], [1], [0, 0, 1, 1], [], []>} : vector<10x32xf32>, vector<32x32xf32>, vector<10x32xf32> -> vector<10x32xf32>
    %61 = vector.broadcast %8 : vector<1x32xf32> to vector<10x32xf32>
    %62 = arith.addf %60, %61 : vector<10x32xf32>
    %63 = arith.addf %0, %62 : vector<10x32xf32>
    %cst_31 = arith.constant dense<0.000000e+00> : vector<10xf32>
    %64 = vector.multi_reduction <add>, %63, %cst_31 [1] : vector<10x32xf32> to vector<10xf32>
    %65 = vector.shape_cast %64 : vector<10xf32> to vector<10x1xf32>
    %cst_32 = arith.constant 3.200000e+01 : f32
    %66 = vector.broadcast %cst_32 : f32 to vector<10x1xf32>
    %67 = arith.divf %65, %66 : vector<10x1xf32>
    %68 = vector.broadcast %67 : vector<10x1xf32> to vector<10x32xf32>
    %69 = arith.subf %63, %68 : vector<10x32xf32>
    %70 = arith.mulf %69, %69 : vector<10x32xf32>
    %cst_33 = arith.constant dense<0.000000e+00> : vector<10xf32>
    %71 = vector.multi_reduction <add>, %70, %cst_33 [1] : vector<10x32xf32> to vector<10xf32>
    %72 = vector.shape_cast %71 : vector<10xf32> to vector<10x1xf32>
    %cst_34 = arith.constant 3.200000e+01 : f32
    %73 = vector.broadcast %cst_34 : f32 to vector<10x1xf32>
    %74 = arith.divf %72, %73 : vector<10x1xf32>
    %75 = vector.broadcast %67 : vector<10x1xf32> to vector<10x32xf32>
    %76 = arith.subf %63, %75 : vector<10x32xf32>
    %cst_35 = arith.constant 9.99999974E-6 : f32
    %77 = vector.broadcast %cst_35 : f32 to vector<10x1xf32>
    %78 = arith.addf %74, %77 : vector<10x1xf32>
    %79 = math.rsqrt %78 : vector<10x1xf32>
    %80 = vector.broadcast %79 : vector<10x1xf32> to vector<10x32xf32>
    %81 = arith.mulf %76, %80 : vector<10x32xf32>
    %82 = vector.broadcast %9 : vector<1x32xf32> to vector<10x32xf32>
    %83 = arith.mulf %81, %82 : vector<10x32xf32>
    %84 = vector.broadcast %10 : vector<1x32xf32> to vector<10x32xf32>
    %85 = arith.addf %83, %84 : vector<10x32xf32>
    %c0_36 = arith.constant 0 : index
    %c0_37 = arith.constant 0 : index
    %c0_38 = arith.constant 0 : index
    %86 = vector.load %arg5[%c0_36, %c0_37, %c0_38] : memref<2x32x128xf32, #tpu.memory_space<vmem>>, vector<1x32x128xf32>
    %87 = vector.shape_cast %86 : vector<1x32x128xf32> to vector<32x128xf32>
    %cst_39 = arith.constant dense<0.000000e+00> : vector<10x128xf32>
    %88 = tpu.matmul %85, %87, %cst_39 {dimension_numbers = #tpu.dot_dimension_numbers<[1], [0], [0], [1], [0, 0, 1, 1], [], []>} : vector<10x32xf32>, vector<32x128xf32>, vector<10x128xf32> -> vector<10x128xf32>
    %c0_40 = arith.constant 0 : index
    %c0_41 = arith.constant 0 : index
    %c0_42 = arith.constant 0 : index
    %89 = vector.load %arg6[%c0_40, %c0_41, %c0_42] : memref<2x1x128xf32, #tpu.memory_space<vmem>>, vector<1x1x128xf32>
    %90 = vector.shape_cast %89 : vector<1x1x128xf32> to vector<1x128xf32>
    %91 = vector.broadcast %90 : vector<1x128xf32> to vector<10x128xf32>
    %92 = arith.addf %88, %91 : vector<10x128xf32>
    %cst_43 = arith.constant 0.000000e+00 : f32
    %93 = vector.broadcast %cst_43 : f32 to vector<10x128xf32>
    %94 = arith.maximumf %92, %93 : vector<10x128xf32>
    %c0_44 = arith.constant 0 : index
    %c0_45 = arith.constant 0 : index
    %c0_46 = arith.constant 0 : index
    %95 = vector.load %arg7[%c0_44, %c0_45, %c0_46] : memref<2x128x32xf32, #tpu.memory_space<vmem>>, vector<1x128x32xf32>
    %96 = vector.shape_cast %95 : vector<1x128x32xf32> to vector<128x32xf32>
    %cst_47 = arith.constant dense<0.000000e+00> : vector<10x32xf32>
    %97 = tpu.matmul %94, %96, %cst_47 {dimension_numbers = #tpu.dot_dimension_numbers<[1], [0], [0], [1], [0, 0, 1, 1], [], []>} : vector<10x128xf32>, vector<128x32xf32>, vector<10x32xf32> -> vector<10x32xf32>
    %98 = vector.broadcast %13 : vector<1x32xf32> to vector<10x32xf32>
    %99 = arith.addf %97, %98 : vector<10x32xf32>
    %100 = arith.addf %85, %99 : vector<10x32xf32>
    %cst_48 = arith.constant dense<0.000000e+00> : vector<10xf32>
    %101 = vector.multi_reduction <add>, %100, %cst_48 [1] : vector<10x32xf32> to vector<10xf32>
    %102 = vector.shape_cast %101 : vector<10xf32> to vector<10x1xf32>
    %cst_49 = arith.constant 3.200000e+01 : f32
    %103 = vector.broadcast %cst_49 : f32 to vector<10x1xf32>
    %104 = arith.divf %102, %103 : vector<10x1xf32>
    %105 = vector.broadcast %104 : vector<10x1xf32> to vector<10x32xf32>
    %106 = arith.subf %100, %105 : vector<10x32xf32>
    %107 = arith.mulf %106, %106 : vector<10x32xf32>
    %cst_50 = arith.constant dense<0.000000e+00> : vector<10xf32>
    %108 = vector.multi_reduction <add>, %107, %cst_50 [1] : vector<10x32xf32> to vector<10xf32>
    %109 = vector.shape_cast %108 : vector<10xf32> to vector<10x1xf32>
    %cst_51 = arith.constant 3.200000e+01 : f32
    %110 = vector.broadcast %cst_51 : f32 to vector<10x1xf32>
    %111 = arith.divf %109, %110 : vector<10x1xf32>
    %112 = vector.broadcast %104 : vector<10x1xf32> to vector<10x32xf32>
    %113 = arith.subf %100, %112 : vector<10x32xf32>
    %cst_52 = arith.constant 9.99999974E-6 : f32
    %114 = vector.broadcast %cst_52 : f32 to vector<10x1xf32>
    %115 = arith.addf %111, %114 : vector<10x1xf32>
    %116 = math.rsqrt %115 : vector<10x1xf32>
    %117 = vector.broadcast %116 : vector<10x1xf32> to vector<10x32xf32>
    %118 = arith.mulf %113, %117 : vector<10x32xf32>
    %119 = vector.broadcast %11 : vector<1x32xf32> to vector<10x32xf32>
    %120 = arith.mulf %118, %119 : vector<10x32xf32>
    %121 = vector.broadcast %12 : vector<1x32xf32> to vector<10x32xf32>
    %122 = arith.addf %120, %121 : vector<10x32xf32>
    %c1_53 = arith.constant 1 : index
    %c0_54 = arith.constant 0 : index
    %c0_55 = arith.constant 0 : index
    %123 = vector.load %arg4[%c1_53, %c0_54, %c0_55] : memref<2x9x32xf32, #tpu.memory_space<vmem>>, vector<1x9x32xf32>
    %124 = vector.shape_cast %123 : vector<1x9x32xf32> to vector<9x32xf32>
    %125 = vector.extract_strided_slice %124 {offsets = [0, 0], sizes = [1, 32], strides = [1, 1]} : vector<9x32xf32> to vector<1x32xf32>
    %126 = vector.extract_strided_slice %124 {offsets = [1, 0], sizes = [1, 32], strides = [1, 1]} : vector<9x32xf32> to vector<1x32xf32>
    %127 = vector.extract_strided_slice %124 {offsets = [2, 0], sizes = [1, 32], strides = [1, 1]} : vector<9x32xf32> to vector<1x32xf32>
    %128 = vector.extract_strided_slice %124 {offsets = [3, 0], sizes = [1, 32], strides = [1, 1]} : vector<9x32xf32> to vector<1x32xf32>
    %129 = vector.extract_strided_slice %124 {offsets = [4, 0], sizes = [1, 32], strides = [1, 1]} : vector<9x32xf32> to vector<1x32xf32>
    %130 = vector.extract_strided_slice %124 {offsets = [5, 0], sizes = [1, 32], strides = [1, 1]} : vector<9x32xf32> to vector<1x32xf32>
    %131 = vector.extract_strided_slice %124 {offsets = [6, 0], sizes = [1, 32], strides = [1, 1]} : vector<9x32xf32> to vector<1x32xf32>
    %132 = vector.extract_strided_slice %124 {offsets = [7, 0], sizes = [1, 32], strides = [1, 1]} : vector<9x32xf32> to vector<1x32xf32>
    %133 = vector.extract_strided_slice %124 {offsets = [8, 0], sizes = [1, 32], strides = [1, 1]} : vector<9x32xf32> to vector<1x32xf32>
    %c1_56 = arith.constant 1 : index
    %c0_57 = arith.constant 0 : index
    %c0_58 = arith.constant 0 : index
    %c0_59 = arith.constant 0 : index
    %134 = vector.load %arg3[%c1_56, %c0_57, %c0_58, %c0_59] : memref<2x4x32x32xf32, #tpu.memory_space<vmem>>, vector<1x1x32x32xf32>
    %135 = vector.shape_cast %134 : vector<1x1x32x32xf32> to vector<32x32xf32>
    %cst_60 = arith.constant dense<0.000000e+00> : vector<10x32xf32>
    %136 = tpu.matmul %122, %135, %cst_60 {dimension_numbers = #tpu.dot_dimension_numbers<[1], [0], [0], [1], [0, 0, 1, 1], [], []>} : vector<10x32xf32>, vector<32x32xf32>, vector<10x32xf32> -> vector<10x32xf32>
    %137 = vector.broadcast %125 : vector<1x32xf32> to vector<10x32xf32>
    %138 = arith.addf %136, %137 : vector<10x32xf32>
    %c1_61 = arith.constant 1 : index
    %c1_62 = arith.constant 1 : index
    %c0_63 = arith.constant 0 : index
    %c0_64 = arith.constant 0 : index
    %139 = vector.load %arg3[%c1_61, %c1_62, %c0_63, %c0_64] : memref<2x4x32x32xf32, #tpu.memory_space<vmem>>, vector<1x1x32x32xf32>
    %140 = vector.shape_cast %139 : vector<1x1x32x32xf32> to vector<32x32xf32>
    %cst_65 = arith.constant dense<0.000000e+00> : vector<10x32xf32>
    %141 = tpu.matmul %122, %140, %cst_65 {dimension_numbers = #tpu.dot_dimension_numbers<[1], [0], [0], [1], [0, 0, 1, 1], [], []>} : vector<10x32xf32>, vector<32x32xf32>, vector<10x32xf32> -> vector<10x32xf32>
    %142 = vector.broadcast %126 : vector<1x32xf32> to vector<10x32xf32>
    %143 = arith.addf %141, %142 : vector<10x32xf32>
    %c1_66 = arith.constant 1 : index
    %c2_67 = arith.constant 2 : index
    %c0_68 = arith.constant 0 : index
    %c0_69 = arith.constant 0 : index
    %144 = vector.load %arg3[%c1_66, %c2_67, %c0_68, %c0_69] : memref<2x4x32x32xf32, #tpu.memory_space<vmem>>, vector<1x1x32x32xf32>
    %145 = vector.shape_cast %144 : vector<1x1x32x32xf32> to vector<32x32xf32>
    %cst_70 = arith.constant dense<0.000000e+00> : vector<10x32xf32>
    %146 = tpu.matmul %122, %145, %cst_70 {dimension_numbers = #tpu.dot_dimension_numbers<[1], [0], [0], [1], [0, 0, 1, 1], [], []>} : vector<10x32xf32>, vector<32x32xf32>, vector<10x32xf32> -> vector<10x32xf32>
    %147 = vector.broadcast %127 : vector<1x32xf32> to vector<10x32xf32>
    %148 = arith.addf %146, %147 : vector<10x32xf32>
    %149 = vector.shape_cast %138 : vector<10x32xf32> to vector<1x10x32xf32>
    %150 = vector.broadcast %149 : vector<1x10x32xf32> to vector<4x10x32xf32>
    %151 = vector.broadcast %1 : vector<4x1x32xf32> to vector<4x10x32xf32>
    %152 = arith.mulf %150, %151 : vector<4x10x32xf32>
    %153 = vector.shape_cast %143 : vector<10x32xf32> to vector<1x10x32xf32>
    %154 = vector.broadcast %153 : vector<1x10x32xf32> to vector<4x10x32xf32>
    %155 = vector.broadcast %1 : vector<4x1x32xf32> to vector<4x10x32xf32>
    %156 = arith.mulf %154, %155 : vector<4x10x32xf32>
    %157 = vector.shape_cast %148 : vector<10x32xf32> to vector<1x10x32xf32>
    %158 = vector.broadcast %157 : vector<1x10x32xf32> to vector<4x10x32xf32>
    %159 = vector.broadcast %1 : vector<4x1x32xf32> to vector<4x10x32xf32>
    %160 = arith.mulf %158, %159 : vector<4x10x32xf32>
    %cst_71 = arith.constant dense<0.000000e+00> : vector<4x10x10xf32>
    %161 = tpu.matmul %152, %156, %cst_71 {dimension_numbers = #tpu.dot_dimension_numbers<[2], [2], [1], [1], [0, 0, 0, 1, 1, 1], [0], [0]>} : vector<4x10x32xf32>, vector<4x10x32xf32>, vector<4x10x10xf32> -> vector<4x10x10xf32>
    %cst_72 = arith.constant 0.353553385 : f32
    %162 = vector.broadcast %cst_72 : f32 to vector<4x10x10xf32>
    %163 = arith.mulf %161, %162 : vector<4x10x10xf32>
    %164 = vector.shape_cast %2 : vector<10x10xf32> to vector<1x10x10xf32>
    %165 = vector.broadcast %164 : vector<1x10x10xf32> to vector<4x10x10xf32>
    %166 = arith.addf %163, %165 : vector<4x10x10xf32>
    %cst_73 = arith.constant dense<0xFF800000> : vector<4x10xf32>
    %167 = vector.multi_reduction <maximumf>, %166, %cst_73 [2] : vector<4x10x10xf32> to vector<4x10xf32>
    %168 = vector.shape_cast %167 : vector<4x10xf32> to vector<4x10x1xf32>
    %169 = vector.broadcast %168 : vector<4x10x1xf32> to vector<4x10x10xf32>
    %170 = arith.subf %166, %169 : vector<4x10x10xf32>
    %171 = math.exp %170 : vector<4x10x10xf32>
    %cst_74 = arith.constant dense<0.000000e+00> : vector<4x10xf32>
    %172 = vector.multi_reduction <add>, %171, %cst_74 [2] : vector<4x10x10xf32> to vector<4x10xf32>
    %173 = vector.shape_cast %172 : vector<4x10xf32> to vector<4x10x1xf32>
    %174 = vector.broadcast %173 : vector<4x10x1xf32> to vector<4x10x10xf32>
    %175 = arith.divf %171, %174 : vector<4x10x10xf32>
    %cst_75 = arith.constant dense<0.000000e+00> : vector<4x10x32xf32>
    %176 = tpu.matmul %175, %160, %cst_75 {dimension_numbers = #tpu.dot_dimension_numbers<[2], [1], [1], [2], [0, 0, 0, 1, 1, 2], [0], [0]>} : vector<4x10x10xf32>, vector<4x10x32xf32>, vector<4x10x32xf32> -> vector<4x10x32xf32>
    %cst_76 = arith.constant dense<0.000000e+00> : vector<10x32xf32>
    %177 = vector.multi_reduction <add>, %176, %cst_76 [0] : vector<4x10x32xf32> to vector<10x32xf32>
    %c1_77 = arith.constant 1 : index
    %c3_78 = arith.constant 3 : index
    %c0_79 = arith.constant 0 : index
    %c0_80 = arith.constant 0 : index
    %178 = vector.load %arg3[%c1_77, %c3_78, %c0_79, %c0_80] : memref<2x4x32x32xf32, #tpu.memory_space<vmem>>, vector<1x1x32x32xf32>
    %179 = vector.shape_cast %178 : vector<1x1x32x32xf32> to vector<32x32xf32>
    %cst_81 = arith.constant dense<0.000000e+00> : vector<10x32xf32>
    %180 = tpu.matmul %177, %179, %cst_81 {dimension_numbers = #tpu.dot_dimension_numbers<[1], [0], [0], [1], [0, 0, 1, 1], [], []>} : vector<10x32xf32>, vector<32x32xf32>, vector<10x32xf32> -> vector<10x32xf32>
    %181 = vector.broadcast %128 : vector<1x32xf32> to vector<10x32xf32>
    %182 = arith.addf %180, %181 : vector<10x32xf32>
    %183 = arith.addf %122, %182 : vector<10x32xf32>
    %cst_82 = arith.constant dense<0.000000e+00> : vector<10xf32>
    %184 = vector.multi_reduction <add>, %183, %cst_82 [1] : vector<10x32xf32> to vector<10xf32>
    %185 = vector.shape_cast %184 : vector<10xf32> to vector<10x1xf32>
    %cst_83 = arith.constant 3.200000e+01 : f32
    %186 = vector.broadcast %cst_83 : f32 to vector<10x1xf32>
    %187 = arith.divf %185, %186 : vector<10x1xf32>
    %188 = vector.broadcast %187 : vector<10x1xf32> to vector<10x32xf32>
    %189 = arith.subf %183, %188 : vector<10x32xf32>
    %190 = arith.mulf %189, %189 : vector<10x32xf32>
    %cst_84 = arith.constant dense<0.000000e+00> : vector<10xf32>
    %191 = vector.multi_reduction <add>, %190, %cst_84 [1] : vector<10x32xf32> to vector<10xf32>
    %192 = vector.shape_cast %191 : vector<10xf32> to vector<10x1xf32>
    %cst_85 = arith.constant 3.200000e+01 : f32
    %193 = vector.broadcast %cst_85 : f32 to vector<10x1xf32>
    %194 = arith.divf %192, %193 : vector<10x1xf32>
    %195 = vector.broadcast %187 : vector<10x1xf32> to vector<10x32xf32>
    %196 = arith.subf %183, %195 : vector<10x32xf32>
    %cst_86 = arith.constant 9.99999974E-6 : f32
    %197 = vector.broadcast %cst_86 : f32 to vector<10x1xf32>
    %198 = arith.addf %194, %197 : vector<10x1xf32>
    %199 = math.rsqrt %198 : vector<10x1xf32>
    %200 = vector.broadcast %199 : vector<10x1xf32> to vector<10x32xf32>
    %201 = arith.mulf %196, %200 : vector<10x32xf32>
    %202 = vector.broadcast %129 : vector<1x32xf32> to vector<10x32xf32>
    %203 = arith.mulf %201, %202 : vector<10x32xf32>
    %204 = vector.broadcast %130 : vector<1x32xf32> to vector<10x32xf32>
    %205 = arith.addf %203, %204 : vector<10x32xf32>
    %c1_87 = arith.constant 1 : index
    %c0_88 = arith.constant 0 : index
    %c0_89 = arith.constant 0 : index
    %206 = vector.load %arg5[%c1_87, %c0_88, %c0_89] : memref<2x32x128xf32, #tpu.memory_space<vmem>>, vector<1x32x128xf32>
    %207 = vector.shape_cast %206 : vector<1x32x128xf32> to vector<32x128xf32>
    %cst_90 = arith.constant dense<0.000000e+00> : vector<10x128xf32>
    %208 = tpu.matmul %205, %207, %cst_90 {dimension_numbers = #tpu.dot_dimension_numbers<[1], [0], [0], [1], [0, 0, 1, 1], [], []>} : vector<10x32xf32>, vector<32x128xf32>, vector<10x128xf32> -> vector<10x128xf32>
    %c1_91 = arith.constant 1 : index
    %c0_92 = arith.constant 0 : index
    %c0_93 = arith.constant 0 : index
    %209 = vector.load %arg6[%c1_91, %c0_92, %c0_93] : memref<2x1x128xf32, #tpu.memory_space<vmem>>, vector<1x1x128xf32>
    %210 = vector.shape_cast %209 : vector<1x1x128xf32> to vector<1x128xf32>
    %211 = vector.broadcast %210 : vector<1x128xf32> to vector<10x128xf32>
    %212 = arith.addf %208, %211 : vector<10x128xf32>
    %cst_94 = arith.constant 0.000000e+00 : f32
    %213 = vector.broadcast %cst_94 : f32 to vector<10x128xf32>
    %214 = arith.maximumf %212, %213 : vector<10x128xf32>
    %c1_95 = arith.constant 1 : index
    %c0_96 = arith.constant 0 : index
    %c0_97 = arith.constant 0 : index
    %215 = vector.load %arg7[%c1_95, %c0_96, %c0_97] : memref<2x128x32xf32, #tpu.memory_space<vmem>>, vector<1x128x32xf32>
    %216 = vector.shape_cast %215 : vector<1x128x32xf32> to vector<128x32xf32>
    %cst_98 = arith.constant dense<0.000000e+00> : vector<10x32xf32>
    %217 = tpu.matmul %214, %216, %cst_98 {dimension_numbers = #tpu.dot_dimension_numbers<[1], [0], [0], [1], [0, 0, 1, 1], [], []>} : vector<10x128xf32>, vector<128x32xf32>, vector<10x32xf32> -> vector<10x32xf32>
    %218 = vector.broadcast %133 : vector<1x32xf32> to vector<10x32xf32>
    %219 = arith.addf %217, %218 : vector<10x32xf32>
    %220 = arith.addf %205, %219 : vector<10x32xf32>
    %cst_99 = arith.constant dense<0.000000e+00> : vector<10xf32>
    %221 = vector.multi_reduction <add>, %220, %cst_99 [1] : vector<10x32xf32> to vector<10xf32>
    %222 = vector.shape_cast %221 : vector<10xf32> to vector<10x1xf32>
    %cst_100 = arith.constant 3.200000e+01 : f32
    %223 = vector.broadcast %cst_100 : f32 to vector<10x1xf32>
    %224 = arith.divf %222, %223 : vector<10x1xf32>
    %225 = vector.broadcast %224 : vector<10x1xf32> to vector<10x32xf32>
    %226 = arith.subf %220, %225 : vector<10x32xf32>
    %227 = arith.mulf %226, %226 : vector<10x32xf32>
    %cst_101 = arith.constant dense<0.000000e+00> : vector<10xf32>
    %228 = vector.multi_reduction <add>, %227, %cst_101 [1] : vector<10x32xf32> to vector<10xf32>
    %229 = vector.shape_cast %228 : vector<10xf32> to vector<10x1xf32>
    %cst_102 = arith.constant 3.200000e+01 : f32
    %230 = vector.broadcast %cst_102 : f32 to vector<10x1xf32>
    %231 = arith.divf %229, %230 : vector<10x1xf32>
    %232 = vector.broadcast %224 : vector<10x1xf32> to vector<10x32xf32>
    %233 = arith.subf %220, %232 : vector<10x32xf32>
    %cst_103 = arith.constant 9.99999974E-6 : f32
    %234 = vector.broadcast %cst_103 : f32 to vector<10x1xf32>
    %235 = arith.addf %231, %234 : vector<10x1xf32>
    %236 = math.rsqrt %235 : vector<10x1xf32>
    %237 = vector.broadcast %236 : vector<10x1xf32> to vector<10x32xf32>
    %238 = arith.mulf %233, %237 : vector<10x32xf32>
    %239 = vector.broadcast %131 : vector<1x32xf32> to vector<10x32xf32>
    %240 = arith.mulf %238, %239 : vector<10x32xf32>
    %241 = vector.broadcast %132 : vector<1x32xf32> to vector<10x32xf32>
    %242 = arith.addf %240, %241 : vector<10x32xf32>
    %cst_104 = arith.constant 0.000000e+00 : f32
    %243 = vector.broadcast %cst_104 : f32 to vector<2x64xf32>
    %244 = vector.extract_strided_slice %242 {offsets = [0, 0], sizes = [2, 32], strides = [1, 1]} : vector<10x32xf32> to vector<2x32xf32>
    %c0_105 = arith.constant 0 : index
    %c0_106 = arith.constant 0 : index
    %c0_107 = arith.constant 0 : index
    %245 = vector.load %arg8[%c0_105, %c0_106, %c0_107] : memref<5x32x64xf32, #tpu.memory_space<vmem>>, vector<1x32x64xf32>
    %246 = vector.shape_cast %245 : vector<1x32x64xf32> to vector<32x64xf32>
    %cst_108 = arith.constant dense<0.000000e+00> : vector<2x64xf32>
    %247 = tpu.matmul %244, %246, %cst_108 {dimension_numbers = #tpu.dot_dimension_numbers<[1], [0], [0], [1], [0, 0, 1, 1], [], []>} : vector<2x32xf32>, vector<32x64xf32>, vector<2x64xf32> -> vector<2x64xf32>
    %248 = arith.addf %243, %247 : vector<2x64xf32>
    %249 = vector.extract_strided_slice %242 {offsets = [2, 0], sizes = [2, 32], strides = [1, 1]} : vector<10x32xf32> to vector<2x32xf32>
    %c1_109 = arith.constant 1 : index
    %c0_110 = arith.constant 0 : index
    %c0_111 = arith.constant 0 : index
    %250 = vector.load %arg8[%c1_109, %c0_110, %c0_111] : memref<5x32x64xf32, #tpu.memory_space<vmem>>, vector<1x32x64xf32>
    %251 = vector.shape_cast %250 : vector<1x32x64xf32> to vector<32x64xf32>
    %cst_112 = arith.constant dense<0.000000e+00> : vector<2x64xf32>
    %252 = tpu.matmul %249, %251, %cst_112 {dimension_numbers = #tpu.dot_dimension_numbers<[1], [0], [0], [1], [0, 0, 1, 1], [], []>} : vector<2x32xf32>, vector<32x64xf32>, vector<2x64xf32> -> vector<2x64xf32>
    %253 = arith.addf %248, %252 : vector<2x64xf32>
    %254 = vector.extract_strided_slice %242 {offsets = [4, 0], sizes = [2, 32], strides = [1, 1]} : vector<10x32xf32> to vector<2x32xf32>
    %c2_113 = arith.constant 2 : index
    %c0_114 = arith.constant 0 : index
    %c0_115 = arith.constant 0 : index
    %255 = vector.load %arg8[%c2_113, %c0_114, %c0_115] : memref<5x32x64xf32, #tpu.memory_space<vmem>>, vector<1x32x64xf32>
    %256 = vector.shape_cast %255 : vector<1x32x64xf32> to vector<32x64xf32>
    %cst_116 = arith.constant dense<0.000000e+00> : vector<2x64xf32>
    %257 = tpu.matmul %254, %256, %cst_116 {dimension_numbers = #tpu.dot_dimension_numbers<[1], [0], [0], [1], [0, 0, 1, 1], [], []>} : vector<2x32xf32>, vector<32x64xf32>, vector<2x64xf32> -> vector<2x64xf32>
    %258 = arith.addf %253, %257 : vector<2x64xf32>
    %259 = vector.extract_strided_slice %242 {offsets = [6, 0], sizes = [2, 32], strides = [1, 1]} : vector<10x32xf32> to vector<2x32xf32>
    %c3_117 = arith.constant 3 : index
    %c0_118 = arith.constant 0 : index
    %c0_119 = arith.constant 0 : index
    %260 = vector.load %arg8[%c3_117, %c0_118, %c0_119] : memref<5x32x64xf32, #tpu.memory_space<vmem>>, vector<1x32x64xf32>
    %261 = vector.shape_cast %260 : vector<1x32x64xf32> to vector<32x64xf32>
    %cst_120 = arith.constant dense<0.000000e+00> : vector<2x64xf32>
    %262 = tpu.matmul %259, %261, %cst_120 {dimension_numbers = #tpu.dot_dimension_numbers<[1], [0], [0], [1], [0, 0, 1, 1], [], []>} : vector<2x32xf32>, vector<32x64xf32>, vector<2x64xf32> -> vector<2x64xf32>
    %263 = arith.addf %258, %262 : vector<2x64xf32>
    %264 = vector.extract_strided_slice %242 {offsets = [8, 0], sizes = [2, 32], strides = [1, 1]} : vector<10x32xf32> to vector<2x32xf32>
    %c4 = arith.constant 4 : index
    %c0_121 = arith.constant 0 : index
    %c0_122 = arith.constant 0 : index
    %265 = vector.load %arg8[%c4, %c0_121, %c0_122] : memref<5x32x64xf32, #tpu.memory_space<vmem>>, vector<1x32x64xf32>
    %266 = vector.shape_cast %265 : vector<1x32x64xf32> to vector<32x64xf32>
    %cst_123 = arith.constant dense<0.000000e+00> : vector<2x64xf32>
    %267 = tpu.matmul %264, %266, %cst_123 {dimension_numbers = #tpu.dot_dimension_numbers<[1], [0], [0], [1], [0, 0, 1, 1], [], []>} : vector<2x32xf32>, vector<32x64xf32>, vector<2x64xf32> -> vector<2x64xf32>
    %268 = arith.addf %263, %267 : vector<2x64xf32>
    %c0_124 = arith.constant 0 : index
    %c0_125 = arith.constant 0 : index
    %269 = vector.load %arg9[%c0_124, %c0_125] : memref<1x64xf32, #tpu.memory_space<vmem>>, vector<1x64xf32>
    %270 = vector.broadcast %269 : vector<1x64xf32> to vector<2x64xf32>
    %271 = arith.addf %268, %270 : vector<2x64xf32>
    %cst_126 = arith.constant 0.000000e+00 : f32
    %272 = vector.broadcast %cst_126 : f32 to vector<2x64xf32>
    %273 = arith.maximumf %271, %272 : vector<2x64xf32>
    %c0_127 = arith.constant 0 : index
    %c0_128 = arith.constant 0 : index
    %274 = vector.load %arg10[%c0_127, %c0_128] : memref<64x32xf32, #tpu.memory_space<vmem>>, vector<64x32xf32>
    %cst_129 = arith.constant dense<0.000000e+00> : vector<2x32xf32>
    %275 = tpu.matmul %273, %274, %cst_129 {dimension_numbers = #tpu.dot_dimension_numbers<[1], [0], [0], [1], [0, 0, 1, 1], [], []>} : vector<2x64xf32>, vector<64x32xf32>, vector<2x32xf32> -> vector<2x32xf32>
    %c0_130 = arith.constant 0 : index
    %c0_131 = arith.constant 0 : index
    %276 = vector.load %arg11[%c0_130, %c0_131] : memref<1x32xf32, #tpu.memory_space<vmem>>, vector<1x32xf32>
    %277 = vector.broadcast %276 : vector<1x32xf32> to vector<2x32xf32>
    %278 = arith.addf %275, %277 : vector<2x32xf32>
    %cst_132 = arith.constant 0.000000e+00 : f32
    %279 = vector.broadcast %cst_132 : f32 to vector<2x32xf32>
    %280 = arith.maximumf %278, %279 : vector<2x32xf32>
    %c0_133 = arith.constant 0 : index
    %c0_134 = arith.constant 0 : index
    %281 = vector.load %arg12[%c0_133, %c0_134] : memref<32x2xf32, #tpu.memory_space<vmem>>, vector<32x2xf32>
    %cst_135 = arith.constant dense<0.000000e+00> : vector<2x2xf32>
    %282 = tpu.matmul %280, %281, %cst_135 {dimension_numbers = #tpu.dot_dimension_numbers<[1], [0], [0], [1], [0, 0, 1, 1], [], []>} : vector<2x32xf32>, vector<32x2xf32>, vector<2x2xf32> -> vector<2x2xf32>
    %c0_136 = arith.constant 0 : index
    %c0_137 = arith.constant 0 : index
    %283 = vector.load %arg13[%c0_136, %c0_137] : memref<1x2xf32, #tpu.memory_space<vmem>>, vector<1x2xf32>
    %284 = vector.broadcast %283 : vector<1x2xf32> to vector<2x2xf32>
    %285 = arith.addf %282, %284 : vector<2x2xf32>
    %c0_138 = arith.constant 0 : index
    %c0_139 = arith.constant 0 : index
    %286 = vector.load %arg14[%c0_138, %c0_139] : memref<2x2xf32, #tpu.memory_space<vmem>>, vector<2x2xf32>
    tpu.vector_store %arg14[%c0_138, %c0_139], %285 {strides = array<i32>} : memref<2x2xf32, #tpu.memory_space<vmem>>, vector<2x2xf32>,
    return
  }
}

</mosaic_0001>

<bundles_post_ra>
// kernel: saint_forward.1
= control target key start
LH: loop header
LB: loop body
LE: loop exit
PB: predicated region body
PF: predicated region fallthrough
CT: control target
= control target key end

     0   :  { %vm63_vm0 = vcmask 261120   ;;  %s3163_s0 = inlined_call_operand.vmem [shape: f32[10,32], index: 0, kind: input, shape index: {}]   ;;  %s3164_s1 = inlined_call_operand.vmem [shape: f32[4,1,32], index: 1, kind: input, shape index: {}]   ;;  %s3165_s2 = inlined_call_operand.vmem [shape: f32[10,10], index: 2, kind: input, shape index: {}]   ;;  %s3166_s3 = inlined_call_operand.vmem [shape: f32[2,4,32,32], index: 3, kind: input, shape index: {}]   ;;  %s3167_s4 = inlined_call_operand.vmem [shape: f32[2,9,32], index: 4, kind: input, shape index: {}]   ;;  %s3168_s5 = inlined_call_operand.vmem [shape: f32[2,32,128], index: 5, kind: input, shape index: {}]   ;;  %s3169_s6 = inlined_call_operand.vmem [shape: f32[2,1,128], index: 6, kind: input, shape index: {}]   ;;  %s3170_s7 = inlined_call_operand.vmem [shape: f32[2,128,32], index: 7, kind: input, shape index: {}]   ;;  %s3171_s8 = inlined_call_operand.vmem [shape: f32[5,32,64], index: 8, kind: input, shape index: {}]   ;;  %s3172_s9 = inlined_call_operand.vmem [shape: f32[1,64], index: 9, kind: input, shape index: {}]   ;;  %s3173_s10 = inlined_call_operand.vmem [shape: f32[64,32], index: 10, kind: input, shape index: {}]   ;;  %s3174_s11 = inlined_call_operand.vmem [shape: f32[1,32], index: 11, kind: input, shape index: {}]   ;;  %s3175_s12 = inlined_call_operand.vmem [shape: f32[32,2], index: 12, kind: input, shape index: {}]   ;;  %s3176_s13 = inlined_call_operand.vmem [shape: f32[1,2], index: 13, kind: input, shape index: {}]   ;;  %s3177_s14 = inlined_call_operand.hbm [shape: f32[2,2], index: 14, kind: output, shape index: {}]  }
   0x1   :  { %v1976_v0 = vld [vmem:[%s3166_s3 + $0x38] sm:$0xff]  ;;  %v1975_v1 = vld [vmem:[%s3166_s3 + $0x30] sm:$0xff]  ;;  %v1974_v3 = vld [vmem:[%s3166_s3 + $0x28] sm:$0xff] }
   0x2   :  { %111 = vmatpush.msra.mxu1 %v1976_v0  ;;  %v61_v2 = vld [vmem:[%s3166_s3 + $0x18] sm:$0xff]  ;;  %v60_v4 = vld [vmem:[%s3166_s3 + $0x10] sm:$0xff]  ;;  %v59_v5 = vld [vmem:[%s3166_s3 + $0x8] sm:$0xff] }
   0x3   :  { %82 = vmatpush.msra.mxu0 %v61_v2  ;;  %2121 = vmatpush.msra.mxu2 %v61_v2  ;;  %v1973_v6 = vld [vmem:[%s3166_s3 + $0x20] sm:$0xff]  ;;  %v1982_v9 = vld [vmem:[%s3166_s3 + $0x58] sm:$0xff] }
   0x4   :  { %112 = vmatpush.msra.mxu1 %v1975_v1  ;;  %v2355_v7 = vld [vmem:[%s3163_s0] sm:$0xff] }
   0x5   :  { %83 = vmatpush.msra.mxu0 %v60_v4  ;;  %2122 = vmatpush.msra.mxu2 %v60_v4  ;;  %v58_v8 = vld [vmem:[%s3166_s3] sm:$0xff] }
   0x6   :  { %113 = vmatpush.msra.mxu1 %v1974_v3 }
   0x7   :  { %84 = vmatpush.msra.mxu0 %v59_v5  ;;  %2123 = vmatpush.msra.mxu2 %v59_v5 }
   0x8   :  { %114 = vmatpush.msra.mxu1 %v1973_v6 }
   0x9   :  { %1977 = vmatmul.msk.f32.vlgmr.msra.gmra.mxu1 %vm63_vm0, %v2355_v7  ;;  %85 = vmatpush.msra.mxu0 %v58_v8 }
   0xa   :  { %19 = vsyncpa [#allocation3], 0  ;;  %v2368_v10 = vld [vmem:[%s3163_s0 + $0x8] sm:$0x3]  ;;  %1971 = vmatmul.msk.f32.vlgmr.msra.gmra.mxu0 %vm63_vm0, %v2355_v7  ;;  %2124 = vmatpush.msra.mxu2 %v58_v8  ;;  %v1981_v11 = vld [vmem:[%s3166_s3 + $0x50] sm:$0xff]  ;;  %vm543_vm1 = vcmask 1041408  }
   0xb   :  { %1972 = vmatmul.msk.f32.vlgmr.msra.gmra.mxu2 %vm63_vm0, %v2368_v10  ;;  %v1980_v12 = vld [vmem:[%s3166_s3 + $0x48] sm:$0xff]  ;;  %v1979_v13 = vld [vmem:[%s3166_s3 + $0x40] sm:$0xff]  ;;  %vm343_vm2 = vcmask 80896   ;;  %vm347_vm3 = vcmask 74752   ;;  %s2255_s17 = smov [#allocation2]  }
   0xc   :  { %140 = vmatpush.msrb.mxu2 %v1982_v9  ;;  %v2392_v15 = vld [vmem:[%s3167_s4] sm:$0xff] }
   0xd   :  { %v98_v16 = vperm.slane %v2392_v15, 1  ;;  %v2127_v18 = vld [vmem:[%s3164_s1 + $0x3] ss:$0 sm:$0xff]  ;;  %v62_v19 = vperm.slane %v2392_v15, 0  ;;  %v2128_v21 = vld [vmem:[%s3164_s1] ss:$0 sm:$0xff] }
   0xe   :  { %141 = vmatpush.msrb.mxu2 %v1981_v11  ;;  %v2129_v22 = vld [vmem:[%s3164_s1 + $0x1] ss:$0 sm:$0xff]  ;;  %v2130_v23 = vld [vmem:[%s3164_s1 + $0x2] ss:$0 sm:$0xff]  ;;  %v127_v46 = vperm.slane %v2392_v15, 2 }
   0xf   :  { %v54_v59 = vld [vmem:[%s3165_s2] sm:$0xff] }
  0x10   :  { %142 = vmatpush.msrb.mxu2 %v1980_v12  ;;  %v55_v12 = vld [vmem:[%s3165_s2 + $0x8] sm:$0x3] }
  0x11   :  { %1978 = vmatmul.msk.f32.gmra.mxu1 %vm63_vm0, %v2368_v10 }
  0x12   :  { %143 = vmatpush.msrb.mxu2 %v1979_v13 }
  0x13   :  { %1983 = vmatmul.msk.f32.vlgmr.msrb.gmra.mxu2 %vm63_vm0, %v2355_v7 }
  0x1b   :  { %1984 = vmatmul.msk.f32.gmra.mxu2 %vm63_vm0, %v2368_v10 }
  0x86   :  { %v116_v14 = vpop.f32.mrf.mxu1 }
  0x87   :  { %v87_v24 = vpop.f32.mrf.mxu0  ;;  %v117_v25 = vadd.f32 %v116_v14, %v98_v16 }
  0x88   :  { %v88_v30 = vadd.f32 %v87_v24, %v62_v19 }
  0x89   :  { %v171_v31 = vmul.f32 %v2128_v21, %v117_v25  ;;  %v173_v32 = vmul.f32 %v2129_v22, %v117_v25  ;;  %v175_v33 = vmul.f32 %v2130_v23, %v117_v25  ;;  %v177_v34 = vmul.f32 %v2127_v18, %v117_v25 }
  0x8a   :  { %v163_v35 = vmul.f32 %v2128_v21, %v88_v30  ;;  %v165_v36 = vmul.f32 %v2129_v22, %v88_v30  ;;  %v169_v37 = vmul.f32 %v2127_v18, %v88_v30  ;;  %v167_v38 = vmul.f32 %v2130_v23, %v88_v30 }
  0x8e   :  { %v119_v17 = vpop.f32.mrf.mxu1  ;;  %v90_v39 = vpop.f32.mrf.mxu2 }
  0x8f   :  { %v120_v20 = vadd.f32 %v119_v17, %v98_v16  ;;  %v91_v40 = vadd.f32 %v90_v39, %v62_v19 }
  0x91   :  { %v178_v26 = vmul.f32 %v2127_v18, %v120_v20  ;;  %v172_v27 = vmul.f32 %v2128_v21, %v120_v20  ;;  %v174_v28 = vmul.f32 %v2129_v22, %v120_v20  ;;  %v176_v29 = vmul.f32 %v2130_v23, %v120_v20 }
  0x92   :  { %v164_v41 = vmul.f32 %v2128_v21, %v91_v40  ;;  %v166_v42 = vmul.f32 %v2129_v22, %v91_v40  ;;  %v170_v43 = vmul.f32 %v2127_v18, %v91_v40  ;;  %v168_v44 = vmul.f32 %v2130_v23, %v91_v40 }
  0x93   :  { %1985 = vmatpush.xpose.msk.msra.mxu3 %vm63_vm0, %v172_v27  ;;  %1989 = vmatpush.xpose.msk.msrb.mxu0 %vm63_vm0, %v174_v28 }
  0x94   :  { %1993 = vmatpush.xpose.msk.msrb.mxu1 %vm63_vm0, %v176_v29  ;;  %1997 = vmatpush.xpose.msk.msra.mxu2 %vm63_vm0, %v178_v26 }
  0x96   :  { %v145_v45 = vpop.f32.mrf.mxu2 }
  0x97   :  { %1986 = vmatpush.xpose.msk.msra.mxu3 %vm63_vm0, %v171_v31  ;;  %1990 = vmatpush.xpose.msk.msrb.mxu0 %vm63_vm0, %v173_v32  ;;  %v146_v49 = vadd.f32 %v145_v45, %v127_v46 }
  0x98   :  { %1994 = vmatpush.xpose.msk.msrb.mxu1 %vm63_vm0, %v175_v33  ;;  %1998 = vmatpush.xpose.msk.msra.mxu2 %vm63_vm0, %v177_v34 }
  0x99   :  { %v179_v54 = vmul.f32 %v2128_v21, %v146_v49  ;;  %v181_v55 = vmul.f32 %v2129_v22, %v146_v49  ;;  %v183_v56 = vmul.f32 %v2130_v23, %v146_v49  ;;  %v185_v57 = vmul.f32 %v2127_v18, %v146_v49 }
  0x9a   :  { %1987 = vmatmul.msk.f32.vlgmr.msra.gmra.mxu3 %vm63_vm0, %v163_v35  ;;  %1991 = vmatmul.msk.f32.vlgmr.msrb.gmra.mxu0 %vm63_vm0, %v165_v36 }
  0x9b   :  { %1995 = vmatmul.msk.f32.vlgmr.msrb.gmra.mxu1 %vm63_vm0, %v167_v38  ;;  %1999 = vmatmul.msk.f32.vlgmr.msra.gmra.mxu2 %vm63_vm0, %v169_v37 }
  0x9e   :  { %v148_v47 = vpop.f32.mrf.mxu2 }
  0x9f   :  { %v149_v48 = vadd.f32 %v148_v47, %v127_v46 }
  0xa1   :  { %v182_v50 = vmul.f32 %v2129_v22, %v149_v48  ;;  %v184_v51 = vmul.f32 %v2130_v23, %v149_v48  ;;  %v186_v52 = vmul.f32 %v2127_v18, %v149_v48  ;;  %v180_v53 = vmul.f32 %v2128_v21, %v149_v48 }
  0xa2   :  { %1988 = vmatmul.msk.f32.gmra.mxu3 %vm63_vm0, %v164_v41  ;;  %1992 = vmatmul.msk.f32.gmra.mxu0 %vm63_vm0, %v166_v42 }
  0xa3   :  { %2000 = vmatmul.msk.f32.gmra.mxu2 %vm63_vm0, %v170_v43  ;;  %1996 = vmatmul.msk.f32.gmra.mxu1 %vm63_vm0, %v168_v44 }
  0xa4   :  { %2001 = vmatpush.msk.msrb.mxu3 %vm543_vm1, %v180_v53  ;;  %2004 = vmatpush.msk.msra.mxu0 %vm543_vm1, %v182_v50 }
  0xa5   :  { %2007 = vmatpush.msk.msra.mxu1 %vm543_vm1, %v184_v51  ;;  %2010 = vmatpush.msk.msrb.mxu2 %vm543_vm1, %v186_v52 }
  0xa6   :  { %562 = vmatpush.msrb.mxu3 %v179_v54  ;;  %594 = vmatpush.msra.mxu0 %v181_v55 }
  0xa7   :  { %626 = vmatpush.msra.mxu1 %v183_v56  ;;  %658 = vmatpush.msrb.mxu2 %v185_v57 }
 0x117   :  { %v251_v58 = vpop.f32.mrf.mxu0 }
 0x118   :  { %v329_v60 = vmul.f32 0.35355338, %v251_v58  ;;  %v286_v61 = vpop.f32.mrf.mxu1 }
 0x119   :  { %v331_v62 = vmul.f32 0.35355338, %v286_v61 }
 0x11a   :  { %v337_v63 = vadd.f32 %v329_v60, %v54_v59 }
 0x11b   :  { %v2432_v0 = vadd.f32 %v331_v62, %v54_v59 }
 0x11c   :  { %v351_v1 = vsel %vm343_vm2, %v337_v63, -inf }
 0x11d   :  { %v357_v2 = vsel %vm343_vm2, %v2432_v0, -inf  ;;  %352 = vmax.xlane.f32.xlu1 %v351_v1  ;;  %v216_v3 = vpop.f32.mrf.mxu3 }
 0x11e   :  { %v321_v4 = vpop.f32.mrf.mxu2  ;;  %358 = vmax.xlane.f32.xlu2 %v357_v2  ;;  %v327_v5 = vmul.f32 0.35355338, %v216_v3 }
 0x11f   :  { %v333_v8 = vmul.f32 0.35355338, %v321_v4  ;;  %v254_v17 = vpop.f32.mrf.mxu0 }
 0x120   :  { %v335_v6 = vadd.f32 %v327_v5, %v54_v59  ;;  %v289_v18 = vpop.f32.mrf.mxu1  ;;  %v330_v22 = vmul.f32 0.35355338, %v254_v17 }
 0x121   :  { %v341_v16 = vadd.f32 %v333_v8, %v54_v59  ;;  %v332_v23 = vmul.f32 0.35355338, %v289_v18 }
 0x122   :  { %v344_v9 = vsel %vm343_vm2, %v335_v6, -inf  ;;  %v338_v27 = vadd.f32 %v330_v22, %v55_v12 }
 0x123   :  { %345 = vmax.xlane.f32.xlu0 %v344_v9  ;;  %v363_v24 = vsel %vm343_vm2, %v341_v16, -inf  ;;  %v340_v28 = vadd.f32 %v332_v23, %v55_v12 }
 0x124   :  { %v354_v29 = vsel %vm347_vm3, %v338_v27, -inf }
 0x125   :  { %v219_v11 = vpop.f32.mrf.mxu3  ;;  %v360_v30 = vsel %vm347_vm3, %v340_v28, -inf }
 0x126   :  { %v328_v13 = vmul.f32 0.35355338, %v219_v11  ;;  %v324_v14 = vpop.f32.mrf.mxu2 }
 0x127   :  { %v334_v19 = vmul.f32 0.35355338, %v324_v14 }
 0x128   :  { %v336_v20 = vadd.f32 %v328_v13, %v55_v12 }
 0x129   :  { %v342_v21 = vadd.f32 %v334_v19, %v55_v12 }
 0x12a   :  { %v348_v25 = vsel %vm347_vm3, %v336_v20, -inf }
 0x12b   :  { %v366_v26 = vsel %vm347_vm3, %v342_v21, -inf  ;;  %364 = vmax.xlane.f32.xlu0 %v363_v24  ;;  %349 = vmax.xlane.f32.xlu1 %v348_v25 }
 0x12c   :  { %367 = vmax.xlane.f32.xlu2 %v366_v26 }
 0x133   :  { %355 = vmax.xlane.f32.xlu0 %v354_v29  ;;  %361 = vmax.xlane.f32.xlu1 %v360_v30 }
 0x190   :  { %v353_v31 = vpop.xlane.xlu1 %352 }
 0x191   :  { %v371_v32 = vsub.f32 %v337_v63, %v353_v31  ;;  %v359_v35 = vpop.xlane.xlu2 %358 }
 0x192   :  { %v373_v47 = vsub.f32 %v2432_v0, %v359_v35 }
 0x193   :  { %v381_v33 = vmul.f32 1.442695, %v371_v32 }
 0x194   :  { %v385_v52 = vmul.f32 1.442695, %v373_v47 }
 0x195   :  { %2138 = vpow2.f32 %v381_v33 }
 0x196   :  { %v346_v34 = vpop.xlane.xlu0 %345 }
 0x197   :  { %v369_v36 = vsub.f32 %v335_v6, %v346_v34 }
 0x199   :  { %v377_v37 = vmul.f32 1.442695, %v369_v36 }
 0x19b   :  { %v2446_v38 = vpop.eup %2138  ;;  %2140 = vpow2.f32 %v377_v37 }
 0x19c   :  { %v399_v39 = vsel %vm343_vm2, %v2446_v38, 0.0 }
 0x19d   :  { %400 = vadd.xlane.f32.xlu1 %v399_v39 }
 0x19e   :  { %v365_v40 = vpop.xlane.xlu0 %364  ;;  %v350_v41 = vpop.xlane.xlu1 %349 }
 0x19f   :  { %v368_v42 = vpop.xlane.xlu2 %367  ;;  %v375_v43 = vsub.f32 %v341_v16, %v365_v40  ;;  %v370_v44 = vsub.f32 %v336_v20, %v350_v41 }
 0x1a0   :  { %v376_v45 = vsub.f32 %v342_v21, %v368_v42 }
 0x1a1   :  { %v2450_v46 = vpop.eup %2140  ;;  %v389_v48 = vmul.f32 1.442695, %v375_v43  ;;  %v379_v49 = vmul.f32 1.442695, %v370_v44 }
 0x1a2   :  { %v391_v50 = vmul.f32 1.442695, %v376_v45  ;;  %v393_v51 = vsel %vm343_vm2, %v2450_v46, 0.0 }
 0x1a3   :  { %2142 = vpow2.f32 %v389_v48  ;;  %394 = vadd.xlane.f32.xlu2 %v393_v51  ;;  %v2015_v51 = vld [vmem:[%s3166_s3 + $0x70] sm:$0xff] }
 0x1a4   :  { %2144 = vpow2.f32 %v391_v50 }
 0x1a5   :  { %2146 = vpow2.f32 %v379_v49 }
 0x1a6   :  { %v356_v53 = vpop.xlane.xlu0 %355  ;;  %v362_v54 = vpop.xlane.xlu1 %361  ;;  %2148 = vpow2.f32 %v385_v52 }
 0x1a7   :  { %v372_v55 = vsub.f32 %v338_v27, %v356_v53  ;;  %v374_v58 = vsub.f32 %v340_v28, %v362_v54 }
 0x1a9   :  { %v2455_v56 = vpop.eup %2142  ;;  %v383_v57 = vmul.f32 1.442695, %v372_v55  ;;  %v387_v0 = vmul.f32 1.442695, %v374_v58 }
 0x1aa   :  { %v2457_v59 = vpop.eup %2144  ;;  %v411_v60 = vsel %vm343_vm2, %v2455_v56, 0.0 }
 0x1ab   :  { %v2461_v61 = vpop.eup %2146  ;;  %2150 = vpow2.f32 %v383_v57  ;;  %412 = vadd.xlane.f32.xlu0 %v411_v60  ;;  %v414_v62 = vsel %vm347_vm3, %v2457_v59, 0.0 }
 0x1ac   :  { %415 = vadd.xlane.f32.xlu1 %v414_v62  ;;  %v396_v63 = vsel %vm347_vm3, %v2461_v61, 0.0  ;;  %v2467_v1 = vpop.eup %2148  ;;  %2152 = vpow2.f32 %v387_v0 }
 0x1ad   :  { %397 = vadd.xlane.f32.xlu2 %v396_v63  ;;  %v405_v3 = vsel %vm343_vm2, %v2467_v1, 0.0 }
 0x1b1   :  { %v2469_v2 = vpop.eup %2150 }
 0x1b2   :  { %v402_v4 = vsel %vm347_vm3, %v2469_v2, 0.0  ;;  %v2475_v5 = vpop.eup %2152 }
 0x1b3   :  { %406 = vadd.xlane.f32.xlu0 %v405_v3  ;;  %v408_v6 = vsel %vm347_vm3, %v2475_v5, 0.0 }
 0x1b5   :  { %403 = vadd.xlane.f32.xlu2 %v402_v4 }
 0x1bb   :  { %409 = vadd.xlane.f32.xlu0 %v408_v6 }
 0x210   :  { %v401_v8 = vpop.xlane.xlu1 %400 }
 0x211   :  { %2154 = vrcp.f32 %v401_v8  ;;  %v458_v14 = vand.u32 2147483648, %v401_v8  ;;  %v456_v17 = vand.u32 2147483647, %v401_v8  ;;  %vm452_vm5 = vweird.f32 %v401_v8 }
 0x213   :  { %v459_v22 = vor.u32 1.1754944e-38, %v458_v14  ;;  %vm457_vm7 = vcmp.eq.f32.partialorder %v456_v17, 8.507059e+37 }
 0x216   :  { %v395_v9 = vpop.xlane.xlu2 %394 }
 0x217   :  { %v2155_v11 = vpop.eup %2154  ;;  %2156 = vrcp.f32 %v395_v9  ;;  %v428_v29 = vand.u32 2147483648, %v395_v9  ;;  %v426_v30 = vand.u32 2147483647, %v395_v9  ;;  %vm422_vm9 = vweird.f32 %v395_v9 }
 0x218   :  { %v448_v12 = vmul.f32 %v2155_v11, %v401_v8  ;;  %vm453_vm4 = vweird.f32 %v2155_v11 }
 0x219   :  { %vm454_vm6 = vmor %vm452_vm5, %vm453_vm4  ;;  %v429_v36 = vor.u32 1.1754944e-38, %v428_v29  ;;  %vm427_vm11 = vcmp.eq.f32.partialorder %v426_v30, 8.507059e+37 }
 0x21a   :  { %v449_v13 = vsub.f32 1.0, %v448_v12 }
 0x21c   :  { %v450_v16 = vmul.f32 %v2155_v11, %v449_v13 }
 0x21d   :  { %v2157_v18 = vpop.eup %2156 }
 0x21e   :  { %v451_v19 = vadd.f32 %v2155_v11, %v450_v16  ;;  %v418_v20 = vmul.f32 %v2157_v18, %v395_v9  ;;  %v413_v21 = vpop.xlane.xlu0 %412  ;;  %vm423_vm8 = vweird.f32 %v2157_v18 }
 0x21f   :  { %2158 = vrcp.f32 %v413_v21  ;;  %v2479_v23 = vpop.xlane.xlu1 %415  ;;  %vm2483_vm10 = vmor %vm422_vm9, %vm423_vm8  ;;  %v516_v39 = vand.u32 2147483647, %v413_v21  ;;  %v518_v44 = vand.u32 2147483648, %v413_v21  ;;  %vm512_vm12 = vweird.f32 %v413_v21 }
 0x220   :  { %v455_v24 = vsel %vm454_vm6, %v2155_v11, %v451_v19  ;;  %v419_v25 = vsub.f32 1.0, %v418_v20  ;;  %v398_v26 = vpop.xlane.xlu2 %397  ;;  %2160 = vrcp.f32 %v2479_v23  ;;  %vm527_vm13 = vweird.f32 %v2479_v23 }
 0x221   :  { %v460_v27 = vsel %vm457_vm7, %v459_v22, %v455_v24  ;;  %2162 = vrcp.f32 %v398_v26  ;;  %vm2501_vm15 = vcmp.eq.f32.partialorder %v516_v39, 8.507059e+37  ;;  %v443_v53 = vand.u32 2147483648, %v398_v26 }
 0x222   :  { %v420_v28 = vmul.f32 %v2157_v18, %v419_v25  ;;  %v461_v31 = vmul.f32 %v2446_v38, %v460_v27  ;;  %v441_v57 = vand.u32 2147483647, %v398_v26  ;;  %v519_v60 = vor.u32 1.1754944e-38, %v518_v44 }
 0x223   :  { %vm437_vm6 = vweird.f32 %v398_v26  ;;  %v533_v0 = vand.u32 2147483648, %v2479_v23  ;;  %v531_v3 = vand.u32 2147483647, %v2479_v23  ;;  %v444_v13 = vor.u32 1.1754944e-38, %v443_v53 }
 0x224   :  { %v421_v32 = vadd.f32 %v2157_v18, %v420_v28  ;;  %2005 = vmatmul.msk.f32.vlgmr.msra.gmra.mxu0 %vm343_vm2, %v461_v31  ;;  %vm442_vm9 = vcmp.eq.f32.partialorder %v441_v57, 8.507059e+37 }
 0x225   :  { %v2159_v33 = vpop.eup %2158  ;;  %v534_v27 = vor.u32 1.1754944e-38, %v533_v0 }
 0x226   :  { %v2488_v35 = vpop.eup %2160  ;;  %v508_v37 = vmul.f32 %v2159_v33, %v413_v21  ;;  %v2490_v40 = vpop.xlane.xlu0 %406  ;;  %v425_v41 = vsel %vm2483_vm10, %v2157_v18, %v421_v32  ;;  %vm513_vm14 = vweird.f32 %v2159_v33 }
 0x227   :  { %v2163_v38 = vpop.eup %2162  ;;  %v523_v42 = vmul.f32 %v2488_v35, %v2479_v23  ;;  %2164 = vrcp.f32 %v2490_v40  ;;  %v430_v48 = vsel %vm427_vm11, %v429_v36, %v425_v41  ;;  %vm514_vm5 = vmor %vm512_vm12, %vm513_vm14  ;;  %vm528_vm7 = vweird.f32 %v2488_v35 }
 0x228   :  { %v509_v43 = vsub.f32 1.0, %v508_v37  ;;  %v433_v45 = vmul.f32 %v2163_v38, %v398_v26  ;;  %v2497_v47 = vpop.xlane.xlu2 %403  ;;  %v431_v55 = vmul.f32 %v2450_v46, %v430_v48  ;;  %vm438_vm4 = vweird.f32 %v2163_v38  ;;  %vm2528_vm11 = vmor %vm527_vm13, %vm528_vm7 }
 0x229   :  { %v524_v49 = vsub.f32 1.0, %v523_v42  ;;  %2166 = vrcp.f32 %v2497_v47  ;;  %vm439_vm8 = vmor %vm437_vm6, %vm438_vm4  ;;  %v486_v19 = vand.u32 2147483647, %v2490_v40  ;;  %v488_v20 = vand.u32 2147483648, %v2490_v40 }
 0x22a   :  { %v510_v50 = vmul.f32 %v2159_v33, %v509_v43  ;;  %v434_v52 = vsub.f32 1.0, %v433_v45  ;;  %2002 = vmatmul.msk.f32.vlgmr.msrb.gmra.mxu3 %vm343_vm2, %v431_v55  ;;  %v473_v28 = vand.u32 2147483648, %v2497_v47  ;;  %v471_v29 = vand.u32 2147483647, %v2497_v47 }
 0x22b   :  { %v525_v54 = vmul.f32 %v2488_v35, %v524_v49  ;;  %vm532_vm12 = vcmp.eq.f32.partialorder %v531_v3, 8.507059e+37  ;;  %vm482_vm13 = vweird.f32 %v2490_v40  ;;  %vm487_vm4 = vcmp.eq.f32.partialorder %v486_v19, 8.507059e+37 }
 0x22c   :  { %v511_v58 = vadd.f32 %v2159_v33, %v510_v50  ;;  %v435_v62 = vmul.f32 %v2163_v38, %v434_v52  ;;  %v474_v37 = vor.u32 1.1754944e-38, %v473_v28  ;;  %vm472_vm7 = vcmp.eq.f32.partialorder %v471_v29, 8.507059e+37  ;;  %v2014_v52 = vld [vmem:[%s3166_s3 + $0x68] sm:$0xff] }
 0x22d   :  { %v2165_v63 = vpop.eup %2164  ;;  %v526_v9 = vadd.f32 %v2488_v35, %v525_v54  ;;  %v686_v19 = vperm.slane %v2392_v15, 3  ;;  %v2254_v28 = vmov 32.0  }
 0x22e   :  { %v515_v4 = vsel %vm514_vm5, %v2159_v33, %v511_v58  ;;  %v478_v46 = vmul.f32 %v2165_v63, %v2490_v40  ;;  %v2513_v6 = vpop.xlane.xlu0 %409  ;;  %v436_v8 = vadd.f32 %v2163_v38, %v435_v62  ;;  %vm483_vm10 = vweird.f32 %v2165_v63 }
 0x22f   :  { %v2167_v11 = vpop.eup %2166  ;;  %v520_v12 = vsel %vm2501_vm15, %v519_v60, %v515_v4  ;;  %2168 = vrcp.f32 %v2513_v6  ;;  %vm484_vm15 = vmor %vm482_vm13, %vm483_vm10  ;;  %vm467_vm5 = vweird.f32 %v2497_v47  ;;  %v503_v42 = vand.u32 2147483648, %v2513_v6 }
 0x230   :  { %v479_v14 = vsub.f32 1.0, %v478_v46  ;;  %v463_v16 = vmul.f32 %v2167_v11, %v2497_v47  ;;  %v440_v17 = vsel %vm439_vm8, %v2163_v38, %v436_v8  ;;  %v521_v18 = vmul.f32 %v2455_v56, %v520_v12 }
 0x231   :  { %v445_v21 = vsel %vm442_vm9, %v444_v13, %v440_v17  ;;  %v530_v56 = vsel %vm2528_vm11, %v2488_v35, %v526_v9  ;;  %vm468_vm14 = vweird.f32 %v2167_v11  ;;  %v501_v47 = vand.u32 2147483647, %v2513_v6 }
 0x232   :  { %v480_v24 = vmul.f32 %v2165_v63, %v479_v14  ;;  %v464_v25 = vsub.f32 1.0, %v463_v16  ;;  %v446_v26 = vmul.f32 %v2461_v61, %v445_v21  ;;  %2011 = vmatmul.msk.f32.vlgmr.msrb.gmra.mxu2 %vm343_vm2, %v521_v18  ;;  %v489_v61 = vor.u32 1.1754944e-38, %v488_v20  ;;  %vm469_vm6 = vmor %vm467_vm5, %vm468_vm14 }
 0x233   :  { %v535_v32 = vsel %vm532_vm12, %v534_v27, %v530_v56  ;;  %vm497_vm9 = vweird.f32 %v2513_v6  ;;  %v504_v48 = vor.u32 1.1754944e-38, %v503_v42  ;;  %vm502_vm11 = vcmp.eq.f32.partialorder %v501_v47, 8.507059e+37  ;;  %v777_v42 = vld [vmem:[%s3168_s5 + $0x10] sm:$0xff] }
 0x234   :  { %v481_v23 = vadd.f32 %v2165_v63, %v480_v24  ;;  %v465_v30 = vmul.f32 %v2167_v11, %v464_v25  ;;  %2003 = vmatmul.msk.f32.gmra.mxu3 %vm343_vm2, %v446_v26  ;;  %v536_v38 = vmul.f32 %v2457_v59, %v535_v32  ;;  %vm673_vm12 = vcmask 254976  }
 0x235   :  { %v2169_v31 = vpop.eup %2168  ;;  %2170 = vrcp.f32 %v2254_v28  ;;  %v814_v28 = vld [vmem:[%s3170_s7] sm:$0xff] }
 0x236   :  { %v485_v33 = vsel %vm484_vm15, %v2165_v63, %v481_v23  ;;  %v493_v34 = vmul.f32 %v2169_v31, %v2513_v6  ;;  %v466_v35 = vadd.f32 %v2167_v11, %v465_v30  ;;  %vm498_vm8 = vweird.f32 %v2169_v31 }
 0x237   :  { %v490_v36 = vsel %vm487_vm4, %v489_v61, %v485_v33  ;;  %vm499_vm10 = vmor %vm497_vm9, %vm498_vm8 }
 0x238   :  { %v494_v39 = vsub.f32 1.0, %v493_v34  ;;  %v470_v40 = vsel %vm469_vm6, %v2167_v11, %v466_v35  ;;  %v491_v41 = vmul.f32 %v2467_v1, %v490_v36 }
 0x239   :  { %v475_v43 = vsel %vm472_vm7, %v474_v37, %v470_v40 }
 0x23a   :  { %v495_v44 = vmul.f32 %v2169_v31, %v494_v39  ;;  %v476_v45 = vmul.f32 %v2469_v2, %v475_v43  ;;  %2008 = vmatmul.msk.f32.vlgmr.msra.gmra.mxu1 %vm343_vm2, %v491_v41  ;;  %2012 = vmatmul.msk.f32.gmra.mxu2 %vm343_vm2, %v536_v38  ;;  %v2016_v2 = vld [vmem:[%s3166_s3 + $0x78] sm:$0xff]  ;;  %v776_v43 = vld [vmem:[%s3168_s5 + $0x8] sm:$0xff] }
 0x23b   :  { %705 = vmatpush.msra.mxu3 %v2016_v2  ;;  %v2171_v29 = vpop.eup %2170  ;;  %v778_v38 = vld [vmem:[%s3168_s5 + $0x18] sm:$0xff] }
 0x23c   :  { %2006 = vmatmul.msk.f32.gmra.mxu0 %vm343_vm2, %v476_v45  ;;  %v496_v1 = vadd.f32 %v2169_v31, %v495_v44  ;;  %v725_v23 = vmul.f32 32.0, %v2171_v29  ;;  %vm729_vm13 = vweird.f32 %v2171_v29  ;;  %v775_v44 = vld [vmem:[%s3168_s5] sm:$0xff] }
 0x23d   :  { %706 = vmatpush.msra.mxu3 %v2015_v51  ;;  %801 = vmatpush.msrb.mxu0 %v778_v38  ;;  %v826_v51 = vld [vmem:[%s3170_s7 + $0x60] sm:$0xff] }
 0x23e   :  { %v500_v59 = vsel %vm499_vm10, %v2169_v31, %v496_v1  ;;  %v726_v30 = vsub.f32 1.0, %v725_v23 }
 0x23f   :  { %v505_v49 = vsel %vm502_vm11, %v504_v48, %v500_v59  ;;  %707 = vmatpush.msra.mxu3 %v2014_v52  ;;  %802 = vmatpush.msrb.mxu0 %v777_v42  ;;  %v829_v48 = vld [vmem:[%s3170_s7 + $0x78] sm:$0xff]  ;;  %v828_v59 = vld [vmem:[%s3170_s7 + $0x70] sm:$0xff] }
 0x240   :  { %v506_v50 = vmul.f32 %v2475_v5, %v505_v49  ;;  %v2013_v5 = vld [vmem:[%s3166_s3 + $0x60] sm:$0xff]  ;;  %v727_v31 = vmul.f32 %v2171_v29, %v726_v30  ;;  %831 = vmatpush.msrb.mxu1 %v829_v48  ;;  %v827_v49 = vld [vmem:[%s3170_s7 + $0x68] sm:$0xff] }
 0x241   :  { %708 = vmatpush.msra.mxu3 %v2013_v5  ;;  %803 = vmatpush.msrb.mxu0 %v776_v43 }
 0x242   :  { %2009 = vmatmul.msk.f32.gmra.mxu1 %vm343_vm2, %v506_v50  ;;  %v728_v61 = vadd.f32 %v2171_v29, %v727_v31 }
 0x243   :  { %804 = vmatpush.msrb.mxu0 %v775_v44  ;;  %832 = vmatpush.msrb.mxu1 %v828_v59 }
 0x244   :  { %v2582_v32 = vsel %vm729_vm13, %v2171_v29, %v728_v61  ;;  %v2131_v29 = vld [vmem:[%s3169_s6] ss:$0 sm:$0xff] }
 0x245   :  { %833 = vmatpush.msrb.mxu1 %v827_v49 }
 0x247   :  { %834 = vmatpush.msrb.mxu1 %v826_v51  ;;  %v2032_v51 = vld [vmem:[%s3166_s3 + $0xb8] sm:$0xff] }
 0x248   :  { %962 = vmatpush.msrb.mxu3 %v2032_v51 }
 0x2a1   :  { %v596_v53 = vpop.f32.mrf.mxu0 }
 0x2a2   :  { %v667_v58 = vsel %vm63_vm0, %v596_v53, 0.0  ;;  %v825_v53 = vld [vmem:[%s3170_s7 + $0x58] sm:$0xff] }
 0x2a3   :  { %835 = vmatpush.msrb.mxu1 %v825_v53  ;;  %v2031_v53 = vld [vmem:[%s3166_s3 + $0xb0] sm:$0xff] }
 0x2a4   :  { %963 = vmatpush.msrb.mxu3 %v2031_v53 }
 0x2ad   :  { %v564_v54 = vpop.f32.mrf.mxu3 }
 0x2ae   :  { %v666_v55 = vsel %vm63_vm0, %v564_v54, 0.0 }
 0x2af   :  { %v668_v60 = vadd.f32 %v667_v58, %v666_v55  ;;  %v824_v55 = vld [vmem:[%s3170_s7 + $0x50] sm:$0xff]  ;;  %v823_v58 = vld [vmem:[%s3170_s7 + $0x48] sm:$0xff] }
 0x2b0   :  { %836 = vmatpush.msrb.mxu1 %v824_v55  ;;  %v2024_v55 = vld [vmem:[%s3166_s3 + $0x88] sm:$0xff] }
 0x2b2   :  { %837 = vmatpush.msrb.mxu1 %v823_v58  ;;  %v2036_v58 = vld [vmem:[%s3166_s3 + $0xc8] sm:$0xff] }
 0x2b5   :  { %v660_v57 = vpop.f32.mrf.mxu2 }
 0x2b6   :  { %v671_v4 = vsel %vm63_vm0, %v660_v57, 0.0 }
 0x2b7   :  { %v628_v62 = vpop.f32.mrf.mxu1  ;;  %v567_v46 = vpop.f32.mrf.mxu3 }
 0x2b8   :  { %v669_v63 = vsel %vm63_vm0, %v628_v62, 0.0  ;;  %v674_v9 = vsel %vm673_vm12, %v567_v46, 0.0  ;;  %v822_v62 = vld [vmem:[%s3170_s7 + $0x40] sm:$0xff] }
 0x2b9   :  { %v599_v0 = vpop.f32.mrf.mxu0  ;;  %v670_v3 = vadd.f32 %v669_v63, %v668_v60  ;;  %838 = vmatpush.msrb.mxu1 %v822_v62  ;;  %v2023_v62 = vld [vmem:[%s3166_s3 + $0x80] sm:$0xff] }
 0x2ba   :  { %v675_v8 = vsel %vm673_vm12, %v599_v0, 0.0 }
 0x2bb   :  { %v672_v6 = vadd.f32 %v671_v4, %v670_v3  ;;  %v676_v11 = vadd.f32 %v675_v8, %v674_v9  ;;  %v821_v3 = vld [vmem:[%s3170_s7 + $0x38] sm:$0xff]  ;;  %v820_v8 = vld [vmem:[%s3170_s7 + $0x30] sm:$0xff] }
 0x2bc   :  { %839 = vmatpush.msrb.mxu1 %v821_v3 }
 0x2bd   :  { %2017 = vmatmul.msk.f32.vlgmr.msra.gmra.mxu3 %vm63_vm0, %v672_v6  ;;  %v663_v12 = vpop.f32.mrf.mxu2  ;;  %v769_v6 = vperm.slane %v2392_v15, 4 }
 0x2be   :  { %v679_v17 = vsel %vm673_vm12, %v663_v12, 0.0  ;;  %840 = vmatpush.msrb.mxu1 %v820_v8 }
 0x2bf   :  { %v631_v13 = vpop.f32.mrf.mxu1 }
 0x2c0   :  { %v677_v14 = vsel %vm673_vm12, %v631_v13, 0.0  ;;  %v772_v13 = vperm.slane %v2392_v15, 5 }
 0x2c1   :  { %v678_v16 = vadd.f32 %v677_v14, %v676_v11  ;;  %v819_v14 = vld [vmem:[%s3170_s7 + $0x28] sm:$0xff] }
 0x2c2   :  { %841 = vmatpush.msrb.mxu1 %v819_v14 }
 0x2c3   :  { %v680_v18 = vadd.f32 %v679_v17, %v678_v16 }
 0x2c5   :  { %2018 = vmatmul.msk.f32.gmra.mxu3 %vm63_vm0, %v680_v18  ;;  %v818_v18 = vld [vmem:[%s3170_s7 + $0x20] sm:$0xff] }
 0x2c6   :  { %842 = vmatpush.msrb.mxu1 %v818_v18 }
 0x340   :  { %v710_v20 = vpop.f32.mrf.mxu3 }
 0x341   :  { %v711_v21 = vadd.f32 %v710_v20, %v686_v19 }
 0x343   :  { %v716_v22 = vadd.f32 %v711_v21, %v2355_v7  ;;  %v817_v21 = vld [vmem:[%s3170_s7 + $0x18] sm:$0xff] }
 0x344   :  { %843 = vmatpush.msrb.mxu1 %v817_v21 }
 0x345   :  { %v718_v24 = vsel %vm63_vm0, %v716_v22, 0.0 }
 0x346   :  { %719 = vadd.xlane.f32.xlu1 %v718_v24 }
 0x348   :  { %v713_v25 = vpop.f32.mrf.mxu3 }
 0x349   :  { %v714_v26 = vadd.f32 %v713_v25, %v686_v19 }
 0x34b   :  { %v717_v56 = vadd.f32 %v714_v26, %v2368_v10 }
 0x34d   :  { %v721_v27 = vsel %vm673_vm12, %v717_v56, 0.0 }
 0x34e   :  { %722 = vadd.xlane.f32.xlu2 %v721_v27  ;;  %v815_v27 = vld [vmem:[%s3170_s7 + $0x8] sm:$0xff] }
 0x3b9   :  { %v720_v7 = vpop.xlane.xlu1 %719 }
 0x3ba   :  { %v731_v33 = vmul.f32 %v2582_v32, %v720_v7 }
 0x3bc   :  { %v733_v34 = vsub.f32 %v716_v22, %v731_v33 }
 0x3be   :  { %v735_v35 = vmul.f32 %v733_v34, %v733_v34 }
 0x3c0   :  { %v737_v10 = vsel %vm63_vm0, %v735_v35, 0.0 }
 0x3c1   :  { %v723_v36 = vpop.xlane.xlu2 %722  ;;  %738 = vadd.xlane.f32.xlu0 %v737_v10 }
 0x3c2   :  { %v732_v37 = vmul.f32 %v2582_v32, %v723_v36 }
 0x3c4   :  { %v2587_v39 = vsub.f32 %v717_v56, %v732_v37  ;;  %v816_v56 = vld [vmem:[%s3170_s7 + $0x10] sm:$0xff] }
 0x3c5   :  { %844 = vmatpush.msrb.mxu1 %v816_v56 }
 0x3c6   :  { %v736_v40 = vmul.f32 %v2587_v39, %v2587_v39 }
 0x3c7   :  { %845 = vmatpush.msrb.mxu1 %v815_v27 }
 0x3c8   :  { %v740_v41 = vsel %vm673_vm12, %v736_v40, 0.0 }
 0x3c9   :  { %741 = vadd.xlane.f32.xlu1 %v740_v41  ;;  %846 = vmatpush.msrb.mxu1 %v814_v28 }
 0x434   :  { %v739_v45 = vpop.xlane.xlu0 %738 }
 0x435   :  { %v743_v47 = vmul.f32 %v739_v45, %v2582_v32 }
 0x437   :  { %v745_v1 = vadd.f32 1e-05, %v743_v47 }
 0x439   :  { %2172 = vrsqrt.f32 %v745_v1  ;;  %vm753_vm15 = vweird.f32 %v745_v1 }
 0x43c   :  { %v742_v50 = vpop.xlane.xlu1 %741 }
 0x43d   :  { %v744_v2 = vmul.f32 %v742_v50, %v2582_v32 }
 0x43f   :  { %v2173_v52 = vpop.eup %2172  ;;  %v746_v5 = vadd.f32 1e-05, %v744_v2  ;;  %v2026_v2 = vld [vmem:[%s3166_s3 + $0x98] sm:$0xff] }
 0x440   :  { %v748_v54 = vmul.f32 %v2173_v52, %v745_v1  ;;  %vm754_vm14 = vweird.f32 %v2173_v52  ;;  %933 = vmatpush.msra.mxu2 %v2026_v2 }
 0x441   :  { %2174 = vrsqrt.f32 %v746_v5  ;;  %vm755_vm4 = vmor %vm753_vm15, %vm754_vm14  ;;  %vm763_vm6 = vweird.f32 %v746_v5 }
 0x442   :  { %v749_v57 = vmul.f32 %v2173_v52, %v748_v54  ;;  %v2037_v54 = vld [vmem:[%s3166_s3 + $0xd0] sm:$0xff] }
 0x444   :  { %v750_v60 = vmul.f32 0.5, %v749_v57  ;;  %v2030_v57 = vld [vmem:[%s3166_s3 + $0xa8] sm:$0xff] }
 0x445   :  { %964 = vmatpush.msrb.mxu3 %v2030_v57 }
 0x446   :  { %v751_v63 = vsub.f32 1.5, %v750_v60 }
 0x447   :  { %v2175_v0 = vpop.eup %2174 }
 0x448   :  { %v752_v4 = vmul.f32 %v2173_v52, %v751_v63  ;;  %v758_v46 = vmul.f32 %v2175_v0, %v746_v5  ;;  %vm764_vm5 = vweird.f32 %v2175_v0  ;;  %v2025_v5 = vld [vmem:[%s3166_s3 + $0x90] sm:$0xff]  ;;  %v2029_v63 = vld [vmem:[%s3166_s3 + $0xa0] sm:$0xff] }
 0x449   :  { %vm765_vm7 = vmor %vm763_vm6, %vm764_vm5  ;;  %934 = vmatpush.msra.mxu2 %v2025_v5  ;;  %965 = vmatpush.msrb.mxu3 %v2029_v63 }
 0x44a   :  { %v756_v9 = vsel %vm755_vm4, %v2173_v52, %v752_v4  ;;  %v759_v11 = vmul.f32 %v2175_v0, %v758_v46  ;;  %v2038_v52 = vld [vmem:[%s3166_s3 + $0xd8] sm:$0xff] }
 0x44b   :  { %v767_v12 = vmul.f32 %v756_v9, %v733_v34  ;;  %v2132_v34 = vld [vmem:[%s3167_s4 + $0x8] ss:$0 sm:$0xff]  ;;  %991 = vmatpush.msra.mxu0 %v2038_v52  ;;  %935 = vmatpush.msra.mxu2 %v2024_v55 }
 0x44c   :  { %v760_v16 = vmul.f32 0.5, %v759_v11 }
 0x44d   :  { %v770_v17 = vmul.f32 %v769_v6, %v767_v12  ;;  %992 = vmatpush.msra.mxu0 %v2037_v54  ;;  %936 = vmatpush.msra.mxu2 %v2023_v62 }
 0x44e   :  { %v761_v19 = vsub.f32 1.5, %v760_v16 }
 0x44f   :  { %v773_v20 = vadd.f32 %v772_v13, %v770_v17  ;;  %993 = vmatpush.msra.mxu0 %v2036_v58 }
 0x450   :  { %v762_v15 = vmul.f32 %v2175_v0, %v761_v19  ;;  %v2220_v19 = vld [vmem:[%s3167_s4] sm:$0xff] }
 0x451   :  { %2019 = vmatmul.msk.f32.vlgmr.msrb.gmra.mxu0 %vm63_vm0, %v773_v20 }
 0x452   :  { %v766_v22 = vsel %vm765_vm7, %v2175_v0, %v762_v15  ;;  %v2035_v0 = vld [vmem:[%s3166_s3 + $0xc0] sm:$0xff] }
 0x453   :  { %v768_v24 = vmul.f32 %v766_v22, %v2587_v39  ;;  %994 = vmatpush.msra.mxu0 %v2035_v0 }
 0x455   :  { %v771_v25 = vmul.f32 %v769_v6, %v768_v24  ;;  %v903_v24 = vperm.slane %v2220_v19, 7 }
 0x457   :  { %v774_v26 = vadd.f32 %v772_v13, %v771_v25 }
 0x459   :  { %2020 = vmatmul.msk.f32.gmra.mxu0 %vm63_vm0, %v774_v26 }
 0x4ce   :  { %v806_v23 = vpop.f32.mrf.mxu0 }
 0x4cf   :  { %v807_v30 = vadd.f32 %v2131_v29, %v806_v23 }
 0x4d1   :  { %v812_v31 = vmax.f32 %v807_v30, 0.0 }
 0x4d3   :  { %847 = vmatmul.f32.vlgmr.msrb.gmra.mxu1 %v812_v31 }
 0x4d6   :  { %v809_v61 = vpop.f32.mrf.mxu0 }
 0x4d7   :  { %v810_v7 = vadd.f32 %v2131_v29, %v809_v61 }
 0x4d9   :  { %v813_v33 = vmax.f32 %v810_v7, 0.0 }
 0x4db   :  { %850 = vmatmul.f32.gmra.mxu1 %v813_v33  ;;  %v2736_v33 = vld [vmem:[%s3167_s4 + $0x10] sm:$0xff] }
 0x550   :  { %v848_v35 = vpop.f32.mrf.mxu1 }
 0x551   :  { %v849_v10 = vadd.f32 %v2132_v34, %v848_v35 }
 0x553   :  { %v854_v36 = vadd.f32 %v849_v10, %v773_v20  ;;  %v900_v20 = vperm.slane %v2220_v19, 6 }
 0x555   :  { %v856_v37 = vsel %vm63_vm0, %v854_v36, 0.0 }
 0x556   :  { %857 = vadd.xlane.f32.xlu2 %v856_v37  ;;  %v914_v37 = vperm.slane %v2736_v33, 0 }
 0x558   :  { %v851_v39 = vpop.f32.mrf.mxu1 }
 0x559   :  { %v852_v40 = vadd.f32 %v2132_v34, %v851_v39  ;;  %v949_v34 = vperm.slane %v2736_v33, 1 }
 0x55b   :  { %v855_v41 = vadd.f32 %v852_v40, %v774_v26 }
 0x55d   :  { %v859_v38 = vsel %vm673_vm12, %v855_v41, 0.0 }
 0x55e   :  { %860 = vadd.xlane.f32.xlu0 %v859_v38  ;;  %v2221_v38 = vld [vmem:[%s3164_s1] ss:$0 sm:$0xff] }
 0x5c9   :  { %v858_v42 = vpop.xlane.xlu2 %857 }
 0x5ca   :  { %v862_v43 = vmul.f32 %v858_v42, %v2582_v32 }
 0x5cc   :  { %v864_v44 = vsub.f32 %v854_v36, %v862_v43  ;;  %v978_v36 = vperm.slane %v2736_v33, 2  ;;  %v2222_v43 = vld [vmem:[%s3164_s1 + $0x1] ss:$0 sm:$0xff] }
 0x5ce   :  { %v866_v45 = vmul.f32 %v864_v44, %v864_v44 }
 0x5d0   :  { %v868_v47 = vsel %vm63_vm0, %v866_v45, 0.0  ;;  %v2223_v45 = vld [vmem:[%s3164_s1 + $0x2] ss:$0 sm:$0xff] }
 0x5d1   :  { %869 = vadd.xlane.f32.xlu1 %v868_v47  ;;  %v861_v1 = vpop.xlane.xlu0 %860 }
 0x5d2   :  { %v863_v48 = vmul.f32 %v861_v1, %v2582_v32  ;;  %v2224_v1 = vld [vmem:[%s3164_s1 + $0x3] ss:$0 sm:$0xff] }
 0x5d4   :  { %v2670_v59 = vsub.f32 %v855_v41, %v863_v48 }
 0x5d6   :  { %v867_v49 = vmul.f32 %v2670_v59, %v2670_v59 }
 0x5d8   :  { %v871_v50 = vsel %vm673_vm12, %v867_v49, 0.0 }
 0x5d9   :  { %872 = vadd.xlane.f32.xlu2 %v871_v50 }
 0x644   :  { %v870_v60 = vpop.xlane.xlu1 %869 }
 0x645   :  { %v874_v3 = vmul.f32 %v870_v60, %v2582_v32 }
 0x647   :  { %v876_v4 = vadd.f32 1e-05, %v874_v3 }
 0x649   :  { %2176 = vrsqrt.f32 %v876_v4  ;;  %vm884_vm9 = vweird.f32 %v876_v4 }
 0x64c   :  { %v873_v46 = vpop.xlane.xlu2 %872 }
 0x64d   :  { %v875_v6 = vmul.f32 %v873_v46, %v2582_v32 }
 0x64f   :  { %v2177_v8 = vpop.eup %2176  ;;  %v877_v9 = vadd.f32 1e-05, %v875_v6 }
 0x650   :  { %v879_v11 = vmul.f32 %v2177_v8, %v876_v4  ;;  %vm885_vm8 = vweird.f32 %v2177_v8 }
 0x651   :  { %2178 = vrsqrt.f32 %v877_v9  ;;  %vm886_vm10 = vmor %vm884_vm9, %vm885_vm8  ;;  %vm894_vm13 = vweird.f32 %v877_v9 }
 0x652   :  { %v880_v12 = vmul.f32 %v2177_v8, %v879_v11 }
 0x654   :  { %v881_v13 = vmul.f32 0.5, %v880_v12 }
 0x656   :  { %v882_v14 = vsub.f32 1.5, %v881_v13 }
 0x657   :  { %v2179_v16 = vpop.eup %2178 }
 0x658   :  { %v883_v17 = vmul.f32 %v2177_v8, %v882_v14  ;;  %v889_v18 = vmul.f32 %v2179_v16, %v877_v9  ;;  %vm895_vm11 = vweird.f32 %v2179_v16 }
 0x659   :  { %vm896_vm14 = vmor %vm894_vm13, %vm895_vm11 }
 0x65a   :  { %v887_v21 = vsel %vm886_vm10, %v2177_v8, %v883_v17  ;;  %v890_v15 = vmul.f32 %v2179_v16, %v889_v18 }
 0x65b   :  { %v898_v22 = vmul.f32 %v887_v21, %v864_v44  ;;  %v2225_v21 = vld [vmem:[%s3165_s2] sm:$0xff] }
 0x65c   :  { %v891_v25 = vmul.f32 0.5, %v890_v15 }
 0x65d   :  { %v901_v26 = vmul.f32 %v900_v20, %v898_v22 }
 0x65e   :  { %v892_v56 = vsub.f32 1.5, %v891_v25 }
 0x65f   :  { %v2716_v27 = vadd.f32 %v903_v24, %v901_v26 }
 0x660   :  { %v893_v28 = vmul.f32 %v2179_v16, %v892_v56 }
 0x661   :  { %2027 = vmatmul.msk.f32.vlgmr.msra.gmra.mxu2 %vm63_vm0, %v2716_v27  ;;  %2033 = vmatmul.msk.f32.vlgmr.msrb.gmra.mxu3 %vm63_vm0, %v2716_v27 }
 0x662   :  { %v897_v29 = vsel %vm896_vm14, %v2179_v16, %v893_v28  ;;  %2039 = vmatmul.msk.f32.vlgmr.msra.gmra.mxu0 %vm63_vm0, %v2716_v27 }
 0x663   :  { %v899_v23 = vmul.f32 %v897_v29, %v2670_v59 }
 0x665   :  { %v902_v30 = vmul.f32 %v900_v20, %v899_v23 }
 0x667   :  { %v2725_v31 = vadd.f32 %v903_v24, %v902_v30 }
 0x669   :  { %2028 = vmatmul.msk.f32.gmra.mxu2 %vm63_vm0, %v2725_v31  ;;  %2034 = vmatmul.msk.f32.gmra.mxu3 %vm63_vm0, %v2725_v31 }
 0x66a   :  { %2040 = vmatmul.msk.f32.gmra.mxu0 %vm63_vm0, %v2725_v31 }
 0x6df   :  { %v996_v61 = vpop.f32.mrf.mxu0 }
 0x6e0   :  { %v997_v5 = vadd.f32 %v996_v61, %v978_v36 }
 0x6e2   :  { %v1018_v3 = vmul.f32 %v2221_v38, %v997_v5  ;;  %v1020_v4 = vmul.f32 %v2222_v43, %v997_v5  ;;  %v1022_v46 = vmul.f32 %v2223_v45, %v997_v5  ;;  %v1024_v6 = vmul.f32 %v2224_v1, %v997_v5 }
 0x6e4   :  { %v967_v7 = vpop.f32.mrf.mxu3  ;;  %v938_v39 = vpop.f32.mrf.mxu2 }
 0x6e5   :  { %v968_v40 = vadd.f32 %v967_v7, %v949_v34  ;;  %v939_v49 = vadd.f32 %v938_v39, %v914_v37 }
 0x6e7   :  { %v999_v41 = vpop.f32.mrf.mxu0  ;;  %v1010_v50 = vmul.f32 %v2221_v38, %v968_v40  ;;  %v1012_v2 = vmul.f32 %v2222_v43, %v968_v40  ;;  %v1014_v51 = vmul.f32 %v2223_v45, %v968_v40  ;;  %v1016_v52 = vmul.f32 %v2224_v1, %v968_v40 }
 0x6e8   :  { %v1000_v59 = vadd.f32 %v999_v41, %v978_v36  ;;  %v1002_v58 = vmul.f32 %v2221_v38, %v939_v49  ;;  %v1004_v60 = vmul.f32 %v2222_v43, %v939_v49  ;;  %v1006_v62 = vmul.f32 %v2223_v45, %v939_v49 }
 0x6e9   :  { %v1008_v63 = vmul.f32 %v2224_v1, %v939_v49 }
 0x6ea   :  { %v1019_v53 = vmul.f32 %v2221_v38, %v1000_v59  ;;  %v1021_v54 = vmul.f32 %v2222_v43, %v1000_v59  ;;  %v1023_v55 = vmul.f32 %v2223_v45, %v1000_v59  ;;  %v1025_v57 = vmul.f32 %v2224_v1, %v1000_v59 }
 0x6ec   :  { %v970_v35 = vpop.f32.mrf.mxu3  ;;  %v941_v0 = vpop.f32.mrf.mxu2 }
 0x6ed   :  { %v971_v10 = vadd.f32 %v970_v35, %v949_v34  ;;  %v942_v8 = vadd.f32 %v941_v0, %v914_v37  ;;  %v2226_v34 = vld [vmem:[%s3165_s2 + $0x8] sm:$0x3] }
 0x6ef   :  { %v1011_v42 = vmul.f32 %v2221_v38, %v971_v10  ;;  %v1013_v44 = vmul.f32 %v2222_v43, %v971_v10  ;;  %v1015_v47 = vmul.f32 %v2223_v45, %v971_v10  ;;  %v1017_v48 = vmul.f32 %v2224_v1, %v971_v10 }
 0x6f0   :  { %v1003_v9 = vmul.f32 %v2221_v38, %v942_v8  ;;  %v1005_v11 = vmul.f32 %v2222_v43, %v942_v8  ;;  %v1007_v12 = vmul.f32 %v2223_v45, %v942_v8  ;;  %v1009_v13 = vmul.f32 %v2224_v1, %v942_v8 }
 0x6f1   :  { %2041 = vmatpush.xpose.msk.msrb.mxu2 %vm63_vm0, %v1011_v42  ;;  %2045 = vmatpush.xpose.msk.msra.mxu3 %vm63_vm0, %v1013_v44 }
 0x6f2   :  { %2049 = vmatpush.xpose.msk.msrb.mxu0 %vm63_vm0, %v1015_v47  ;;  %2053 = vmatpush.xpose.msk.msra.mxu1 %vm63_vm0, %v1017_v48 }
 0x6f5   :  { %2042 = vmatpush.xpose.msk.msrb.mxu2 %vm63_vm0, %v1010_v50  ;;  %2046 = vmatpush.xpose.msk.msra.mxu3 %vm63_vm0, %v1012_v2 }
 0x6f6   :  { %2050 = vmatpush.xpose.msk.msrb.mxu0 %vm63_vm0, %v1014_v51  ;;  %2054 = vmatpush.xpose.msk.msra.mxu1 %vm63_vm0, %v1016_v52 }
 0x6f8   :  { %2043 = vmatmul.msk.f32.vlgmr.msrb.gmra.mxu2 %vm63_vm0, %v1002_v58  ;;  %2047 = vmatmul.msk.f32.vlgmr.msra.gmra.mxu3 %vm63_vm0, %v1004_v60 }
 0x6f9   :  { %2057 = vmatpush.msk.msra.mxu2 %vm543_vm1, %v1019_v53  ;;  %2060 = vmatpush.msk.msrb.mxu3 %vm543_vm1, %v1021_v54 }
 0x6fa   :  { %2063 = vmatpush.msk.msra.mxu0 %vm543_vm1, %v1023_v55  ;;  %2066 = vmatpush.msk.msrb.mxu1 %vm543_vm1, %v1025_v57 }
 0x6fb   :  { %2051 = vmatmul.msk.f32.vlgmr.msrb.gmra.mxu0 %vm63_vm0, %v1006_v62  ;;  %2055 = vmatmul.msk.f32.vlgmr.msra.gmra.mxu1 %vm63_vm0, %v1008_v63 }
 0x6fc   :  { %1398 = vmatpush.msra.mxu2 %v1018_v3  ;;  %1430 = vmatpush.msrb.mxu3 %v1020_v4 }
 0x6fd   :  { %1462 = vmatpush.msra.mxu0 %v1022_v46  ;;  %1494 = vmatpush.msrb.mxu1 %v1024_v6 }
 0x700   :  { %2044 = vmatmul.msk.f32.gmra.mxu2 %vm63_vm0, %v1003_v9  ;;  %2048 = vmatmul.msk.f32.gmra.mxu3 %vm63_vm0, %v1005_v11 }
 0x703   :  { %2052 = vmatmul.msk.f32.gmra.mxu0 %vm63_vm0, %v1007_v12  ;;  %2056 = vmatmul.msk.f32.gmra.mxu1 %vm63_vm0, %v1009_v13 }
 0x778   :  { %v1125_v14 = vpop.f32.mrf.mxu0  ;;  %v1160_v16 = vpop.f32.mrf.mxu1 }
 0x779   :  { %v1170_v24 = vmul.f32 0.35355338, %v1125_v14  ;;  %v1172_v38 = vmul.f32 0.35355338, %v1160_v16 }
 0x77b   :  { %v1055_v17 = vpop.f32.mrf.mxu2  ;;  %v1090_v18 = vpop.f32.mrf.mxu3  ;;  %v1178_v29 = vadd.f32 %v2225_v21, %v1170_v24  ;;  %v1180_v44 = vadd.f32 %v2225_v21, %v1172_v38 }
 0x77c   :  { %v1166_v19 = vmul.f32 0.35355338, %v1055_v17  ;;  %v1168_v20 = vmul.f32 0.35355338, %v1090_v18 }
 0x77d   :  { %v1194_v36 = vsel %vm343_vm2, %v1178_v29, -inf  ;;  %v1200_v1 = vsel %vm343_vm2, %v1180_v44, -inf }
 0x77e   :  { %v1176_v15 = vadd.f32 %v2225_v21, %v1168_v20  ;;  %v1174_v22 = vadd.f32 %v2225_v21, %v1166_v19 }
 0x780   :  { %v1188_v25 = vsel %vm343_vm2, %v1176_v15, -inf  ;;  %v1182_v26 = vsel %vm343_vm2, %v1174_v22, -inf  ;;  %v1128_v61 = vpop.f32.mrf.mxu0  ;;  %v1163_v7 = vpop.f32.mrf.mxu1 }
 0x781   :  { %1189 = vmax.xlane.f32.xlu1 %v1188_v25  ;;  %1183 = vmax.xlane.f32.xlu0 %v1182_v26  ;;  %v1171_v37 = vmul.f32 0.35355338, %v1128_v61  ;;  %v1173_v39 = vmul.f32 0.35355338, %v1163_v7 }
 0x783   :  { %v1058_v56 = vpop.f32.mrf.mxu2  ;;  %v1093_v28 = vpop.f32.mrf.mxu3  ;;  %v1181_v42 = vadd.f32 %v2226_v34, %v1173_v39  ;;  %v1179_v43 = vadd.f32 %v2226_v34, %v1171_v37 }
 0x784   :  { %v1167_v23 = vmul.f32 0.35355338, %v1058_v56  ;;  %v1169_v30 = vmul.f32 0.35355338, %v1093_v28 }
 0x785   :  { %v1203_v45 = vsel %vm347_vm3, %v1181_v42, -inf  ;;  %v1197_v47 = vsel %vm347_vm3, %v1179_v43, -inf }
 0x786   :  { %v1177_v35 = vadd.f32 %v2226_v34, %v1169_v30  ;;  %v1175_v10 = vadd.f32 %v2226_v34, %v1167_v23 }
 0x788   :  { %v1191_v40 = vsel %vm347_vm3, %v1177_v35, -inf  ;;  %v1185_v41 = vsel %vm347_vm3, %v1175_v10, -inf }
 0x789   :  { %1195 = vmax.xlane.f32.xlu1 %v1194_v36  ;;  %1192 = vmax.xlane.f32.xlu0 %v1191_v40 }
 0x78a   :  { %1186 = vmax.xlane.f32.xlu2 %v1185_v41 }
 0x791   :  { %1204 = vmax.xlane.f32.xlu1 %v1203_v45  ;;  %1198 = vmax.xlane.f32.xlu0 %v1197_v47 }
 0x792   :  { %1201 = vmax.xlane.f32.xlu2 %v1200_v1 }
 0x7f4   :  { %v1190_v48 = vpop.xlane.xlu1 %1189  ;;  %v1184_v59 = vpop.xlane.xlu0 %1183 }
 0x7f5   :  { %v1208_v49 = vsub.f32 %v1176_v15, %v1190_v48  ;;  %v1206_v50 = vsub.f32 %v1174_v22, %v1184_v59 }
 0x7f7   :  { %v1218_v2 = vmul.f32 1.442695, %v1208_v49  ;;  %v1214_v51 = vmul.f32 1.442695, %v1206_v50 }
 0x7f9   :  { %2180 = vpow2.f32 %v1218_v2 }
 0x7fa   :  { %2182 = vpow2.f32 %v1214_v51 }
 0x7fc   :  { %v1196_v52 = vpop.xlane.xlu1 %1195  ;;  %v1193_v5 = vpop.xlane.xlu0 %1192 }
 0x7fd   :  { %v1210_v53 = vsub.f32 %v1178_v29, %v1196_v52  ;;  %v1209_v54 = vsub.f32 %v1177_v35, %v1193_v5  ;;  %v1187_v55 = vpop.xlane.xlu2 %1186 }
 0x7fe   :  { %v1207_v57 = vsub.f32 %v1175_v10, %v1187_v55 }
 0x7ff   :  { %v2787_v58 = vpop.eup %2180  ;;  %v1222_v60 = vmul.f32 1.442695, %v1210_v53  ;;  %v1220_v62 = vmul.f32 1.442695, %v1209_v54 }
 0x800   :  { %v2789_v63 = vpop.eup %2182  ;;  %v1216_v0 = vmul.f32 1.442695, %v1207_v57  ;;  %v1236_v3 = vsel %vm343_vm2, %v2787_v58, 0.0 }
 0x801   :  { %2184 = vpow2.f32 %v1222_v60  ;;  %1237 = vadd.xlane.f32.xlu0 %v1236_v3  ;;  %v1230_v4 = vsel %vm343_vm2, %v2789_v63, 0.0 }
 0x802   :  { %2186 = vpow2.f32 %v1220_v62  ;;  %1231 = vadd.xlane.f32.xlu2 %v1230_v4 }
 0x803   :  { %2188 = vpow2.f32 %v1216_v0 }
 0x804   :  { %v1205_v46 = vpop.xlane.xlu1 %1204  ;;  %v1199_v6 = vpop.xlane.xlu0 %1198 }
 0x805   :  { %v1213_v8 = vsub.f32 %v1181_v42, %v1205_v46  ;;  %v1211_v9 = vsub.f32 %v1179_v43, %v1199_v6  ;;  %v1202_v11 = vpop.xlane.xlu2 %1201 }
 0x806   :  { %v1212_v12 = vsub.f32 %v1180_v44, %v1202_v11 }
 0x807   :  { %v2795_v13 = vpop.eup %2184  ;;  %v1228_v14 = vmul.f32 1.442695, %v1213_v8  ;;  %v1224_v16 = vmul.f32 1.442695, %v1211_v9 }
 0x808   :  { %v2797_v17 = vpop.eup %2186  ;;  %v1226_v18 = vmul.f32 1.442695, %v1212_v12  ;;  %v1242_v19 = vsel %vm343_vm2, %v2795_v13, 0.0 }
 0x809   :  { %v2801_v20 = vpop.eup %2188  ;;  %2190 = vpow2.f32 %v1228_v14  ;;  %1243 = vadd.xlane.f32.xlu0 %v1242_v19  ;;  %v1239_v21 = vsel %vm347_vm3, %v2797_v17, 0.0 }
 0x80a   :  { %2192 = vpow2.f32 %v1224_v16  ;;  %1240 = vadd.xlane.f32.xlu2 %v1239_v21  ;;  %v1233_v15 = vsel %vm347_vm3, %v2801_v20, 0.0 }
 0x80b   :  { %2194 = vpow2.f32 %v1226_v18  ;;  %1234 = vadd.xlane.f32.xlu1 %v1233_v15 }
 0x80f   :  { %v2807_v22 = vpop.eup %2190 }
 0x810   :  { %v2809_v24 = vpop.eup %2192  ;;  %v1251_v25 = vsel %vm347_vm3, %v2807_v22, 0.0 }
 0x811   :  { %v2813_v26 = vpop.eup %2194  ;;  %1252 = vadd.xlane.f32.xlu0 %v1251_v25  ;;  %v1245_v56 = vsel %vm347_vm3, %v2809_v24, 0.0 }
 0x812   :  { %1246 = vadd.xlane.f32.xlu2 %v1245_v56  ;;  %v1248_v28 = vsel %vm343_vm2, %v2813_v26, 0.0 }
 0x813   :  { %1249 = vadd.xlane.f32.xlu1 %v1248_v28 }
 0x874   :  { %v1238_v29 = vpop.xlane.xlu0 %1237 }
 0x875   :  { %2196 = vrcp.f32 %v1238_v29  ;;  %v1232_v23 = vpop.xlane.xlu2 %1231  ;;  %v1293_v37 = vand.u32 2147483647, %v1238_v29  ;;  %v1295_v40 = vand.u32 2147483648, %v1238_v29  ;;  %vm1289_vm15 = vweird.f32 %v1238_v29 }
 0x876   :  { %2198 = vrcp.f32 %v1232_v23  ;;  %v1263_v38 = vand.u32 2147483647, %v1232_v23  ;;  %v1265_v43 = vand.u32 2147483648, %v1232_v23  ;;  %vm1259_vm4 = vweird.f32 %v1232_v23 }
 0x877   :  { %vm2829_vm6 = vcmp.eq.f32.partialorder %v1293_v37, 8.507059e+37  ;;  %v1296_v59 = vor.u32 1.1754944e-38, %v1295_v40 }
 0x878   :  { %vm2833_vm7 = vcmp.eq.f32.partialorder %v1263_v38, 8.507059e+37  ;;  %v1266_v52 = vor.u32 1.1754944e-38, %v1265_v43 }
 0x87b   :  { %v2197_v30 = vpop.eup %2196 }
 0x87c   :  { %v2199_v61 = vpop.eup %2198  ;;  %v1285_v7 = vmul.f32 %v2197_v30, %v1238_v29  ;;  %v1244_v34 = vpop.xlane.xlu0 %1243  ;;  %vm1290_vm1 = vweird.f32 %v2197_v30 }
 0x87d   :  { %v1255_v35 = vmul.f32 %v2199_v61, %v1232_v23  ;;  %2200 = vrcp.f32 %v1244_v34  ;;  %v2819_v10 = vpop.xlane.xlu2 %1240  ;;  %vm1260_vm3 = vweird.f32 %v2199_v61  ;;  %vm2825_vm5 = vmor %vm1289_vm15, %vm1290_vm1  ;;  %v1323_v53 = vand.u32 2147483647, %v1244_v34 }
 0x87e   :  { %v1286_v36 = vsub.f32 1.0, %v1285_v7  ;;  %v2821_v39 = vpop.xlane.xlu1 %1234  ;;  %2202 = vrcp.f32 %v2819_v10  ;;  %vm2839_vm8 = vmor %vm1259_vm4, %vm1260_vm3  ;;  %v1325_v54 = vand.u32 2147483648, %v1244_v34  ;;  %vm1319_vm9 = vweird.f32 %v1244_v34 }
 0x87f   :  { %v1256_v41 = vsub.f32 1.0, %v1255_v35  ;;  %2204 = vrcp.f32 %v2821_v39  ;;  %vm1274_vm10 = vweird.f32 %v2821_v39  ;;  %v1280_v8 = vand.u32 2147483648, %v2821_v39 }
 0x880   :  { %v1287_v42 = vmul.f32 %v2197_v30, %v1286_v36  ;;  %vm2864_vm13 = vcmp.eq.f32.partialorder %v1323_v53, 8.507059e+37  ;;  %v1326_v19 = vor.u32 1.1754944e-38, %v1325_v54  ;;  %v1310_v56 = vand.u32 2147483648, %v2819_v10 }
 0x881   :  { %v1257_v44 = vmul.f32 %v2199_v61, %v1256_v41  ;;  %v1278_v28 = vand.u32 2147483647, %v2821_v39  ;;  %vm1304_vm3 = vweird.f32 %v2819_v10 }
 0x882   :  { %v1288_v45 = vadd.f32 %v2197_v30, %v1287_v42  ;;  %v1311_v43 = vor.u32 1.1754944e-38, %v1310_v56 }
 0x883   :  { %v2201_v47 = vpop.eup %2200  ;;  %v1258_v49 = vadd.f32 %v2199_v61, %v1257_v44 }
 0x884   :  { %v2837_v2 = vpop.eup %2202  ;;  %v1315_v5 = vmul.f32 %v2201_v47, %v1244_v34  ;;  %v2843_v55 = vpop.xlane.xlu0 %1252  ;;  %v1292_v60 = vsel %vm2825_vm5, %v2197_v30, %v1288_v45  ;;  %vm1320_vm11 = vweird.f32 %v2201_v47  ;;  %v1281_v34 = vor.u32 1.1754944e-38, %v1280_v8 }
 0x885   :  { %v2205_v57 = vpop.eup %2204  ;;  %v1262_v62 = vsel %vm2839_vm8, %v2199_v61, %v1258_v49  ;;  %v1300_v0 = vmul.f32 %v2837_v2, %v2819_v10  ;;  %2206 = vrcp.f32 %v2843_v55  ;;  %v2856_v6 = vpop.xlane.xlu2 %1246  ;;  %v1297_v11 = vsel %vm2829_vm6, %v1296_v59, %v1292_v60  ;;  %vm1321_vm14 = vmor %vm1319_vm9, %vm1320_vm11 }
 0x886   :  { %v1316_v3 = vsub.f32 1.0, %v1315_v5  ;;  %v1270_v4 = vmul.f32 %v2205_v57, %v2821_v39  ;;  %v2854_v46 = vpop.xlane.xlu1 %1249  ;;  %v1267_v12 = vsel %vm2833_vm7, %v1266_v52, %v1262_v62  ;;  %v1298_v30 = vmul.f32 %v2787_v58, %v1297_v11 }
 0x887   :  { %v1301_v9 = vsub.f32 1.0, %v1300_v0  ;;  %2208 = vrcp.f32 %v2854_v46  ;;  %v1268_v23 = vmul.f32 %v2789_v63, %v1267_v12  ;;  %vm1275_vm1 = vweird.f32 %v2205_v57 }
 0x888   :  { %v1317_v14 = vmul.f32 %v2201_v47, %v1316_v3  ;;  %v1271_v16 = vsub.f32 1.0, %v1270_v4  ;;  %2210 = vrcp.f32 %v2856_v6  ;;  %v1308_v61 = vand.u32 2147483647, %v2819_v10  ;;  %2061 = vmatmul.msk.f32.vlgmr.msrb.gmra.mxu3 %vm343_vm2, %v1298_v30  ;;  %vm1276_vm15 = vmor %vm1274_vm10, %vm1275_vm1 }
 0x889   :  { %v1302_v21 = vmul.f32 %v2837_v2, %v1301_v9  ;;  %2058 = vmatmul.msk.f32.vlgmr.msra.gmra.mxu2 %vm343_vm2, %v1268_v23  ;;  %vm1305_vm4 = vweird.f32 %v2837_v2  ;;  %vm1279_vm5 = vcmp.eq.f32.partialorder %v1278_v28, 8.507059e+37  ;;  %v1353_v1 = vand.u32 2147483647, %v2854_v46 }
 0x88a   :  { %v1318_v15 = vadd.f32 %v2201_v47, %v1317_v14  ;;  %v1272_v25 = vmul.f32 %v2205_v57, %v1271_v16  ;;  %vm1306_vm6 = vmor %vm1304_vm3, %vm1305_vm4  ;;  %vm1309_vm7 = vcmp.eq.f32.partialorder %v1308_v61, 8.507059e+37  ;;  %v1355_v48 = vand.u32 2147483648, %v2854_v46 }
 0x88b   :  { %v2872_v29 = vpop.eup %2206  ;;  %v1303_v37 = vadd.f32 %v2837_v2, %v1302_v21  ;;  %vm1349_vm9 = vweird.f32 %v2854_v46  ;;  %v1340_v52 = vand.u32 2147483648, %v2856_v6  ;;  %v1338_v54 = vand.u32 2147483647, %v2856_v6 }
 0x88c   :  { %v1322_v7 = vsel %vm1321_vm14, %v2201_v47, %v1318_v15  ;;  %v1360_v35 = vmul.f32 %v2872_v29, %v2843_v55  ;;  %v1273_v36 = vadd.f32 %v2205_v57, %v1272_v25  ;;  %vm1334_vm14 = vweird.f32 %v2856_v6 }
 0x88d   :  { %v2209_v40 = vpop.eup %2208  ;;  %v1327_v41 = vsel %vm2864_vm13, %v1326_v19, %v1322_v7  ;;  %v1307_v10 = vsel %vm1306_vm6, %v2837_v2, %v1303_v37  ;;  %vm1354_vm13 = vcmp.eq.f32.partialorder %v1353_v1, 8.507059e+37  ;;  %vm1365_vm1 = vweird.f32 %v2872_v29 }
 0x88e   :  { %v1361_v58 = vsub.f32 1.0, %v1360_v35  ;;  %v1345_v63 = vmul.f32 %v2209_v40, %v2854_v46  ;;  %v1277_v38 = vsel %vm1276_vm15, %v2205_v57, %v1273_v36  ;;  %v2211_v42 = vpop.eup %2210  ;;  %v1328_v45 = vmul.f32 %v2795_v13, %v1327_v41 }
 0x88f   :  { %v1282_v44 = vsel %vm1279_vm5, %v1281_v34, %v1277_v38  ;;  %v1330_v39 = vmul.f32 %v2211_v42, %v2856_v6  ;;  %vm1350_vm8 = vweird.f32 %v2209_v40  ;;  %v1312_v49 = vsel %vm1309_vm7, %v1311_v43, %v1307_v10 }
 0x890   :  { %v1346_v47 = vsub.f32 1.0, %v1345_v63  ;;  %v1283_v59 = vmul.f32 %v2801_v20, %v1282_v44  ;;  %2064 = vmatmul.msk.f32.vlgmr.msra.gmra.mxu0 %vm343_vm2, %v1328_v45  ;;  %v1362_v50 = vmul.f32 %v2872_v29, %v1361_v58  ;;  %v1313_v13 = vmul.f32 %v2797_v17, %v1312_v49  ;;  %vm1351_vm11 = vmor %vm1349_vm9, %vm1350_vm8 }
 0x891   :  { %v1331_v2 = vsub.f32 1.0, %v1330_v39  ;;  %vm1335_vm10 = vweird.f32 %v2211_v42  ;;  %v1356_v20 = vor.u32 1.1754944e-38, %v1355_v48  ;;  %vm1364_vm3 = vweird.f32 %v2843_v55 }
 0x892   :  { %v1347_v51 = vmul.f32 %v2209_v40, %v1346_v47  ;;  %2059 = vmatmul.msk.f32.gmra.mxu2 %vm343_vm2, %v1283_v59  ;;  %2062 = vmatmul.msk.f32.gmra.mxu3 %vm343_vm2, %v1313_v13  ;;  %v1363_v60 = vadd.f32 %v2872_v29, %v1362_v50  ;;  %v1370_v62 = vand.u32 2147483648, %v2843_v55  ;;  %v1341_v3 = vor.u32 1.1754944e-38, %v1340_v52  ;;  %vm1336_vm15 = vmor %vm1334_vm14, %vm1335_vm10 }
 0x893   :  { %v1332_v53 = vmul.f32 %v2211_v42, %v1331_v2  ;;  %vm1339_vm4 = vcmp.eq.f32.partialorder %v1338_v54, 8.507059e+37  ;;  %v1368_v6 = vand.u32 2147483647, %v2843_v55  ;;  %vm1366_vm5 = vmor %vm1364_vm3, %vm1365_vm1  ;;  %v2070_v55 = vld [vmem:[%s3166_s3 + $0xe8] sm:$0xff]  ;;  %v1521_v43 = vperm.slane %v2736_v33, 3  ;;  %v2078_v54 = vld [vmem:[%s3168_s5 + $0x38] sm:$0xff] }
 0x894   :  { %v1348_v5 = vadd.f32 %v2209_v40, %v1347_v51  ;;  %v1367_v11 = vsel %vm1366_vm5, %v2872_v29, %v1363_v60  ;;  %v1371_v12 = vor.u32 1.1754944e-38, %v1370_v62  ;;  %1631 = vmatpush.msra.mxu3 %v2078_v54  ;;  %v2075_v62 = vld [vmem:[%s3168_s5 + $0x20] sm:$0xff]  ;;  %vm1953_vm5 = vcmask 9216  }
 0x895   :  { %v1333_v57 = vadd.f32 %v2211_v42, %v1332_v53  ;;  %vm1369_vm6 = vcmp.eq.f32.partialorder %v1368_v6, 8.507059e+37 }
 0x896   :  { %v1352_v17 = vsel %vm1351_vm11, %v2209_v40, %v1348_v5  ;;  %v1372_v14 = vsel %vm1369_vm6, %v1371_v12, %v1367_v11 }
 0x897   :  { %v1357_v0 = vsel %vm1354_vm13, %v1356_v20, %v1352_v17  ;;  %v1337_v4 = vsel %vm1336_vm15, %v2211_v42, %v1333_v57  ;;  %v1373_v16 = vmul.f32 %v2807_v22, %v1372_v14  ;;  %v2069_v22 = vld [vmem:[%s3166_s3 + $0xe0] sm:$0xff]  ;;  %v2077_v20 = vld [vmem:[%s3168_s5 + $0x30] sm:$0xff]  ;;  %v2076_v57 = vld [vmem:[%s3168_s5 + $0x28] sm:$0xff] }
 0x898   :  { %v1358_v46 = vmul.f32 %v2813_v26, %v1357_v0  ;;  %v1342_v8 = vsel %vm1339_vm4, %v1341_v3, %v1337_v4  ;;  %v2072_v26 = vld [vmem:[%s3166_s3 + $0xf8] sm:$0xff]  ;;  %1632 = vmatpush.msra.mxu3 %v2077_v20  ;;  %v2096_v4 = vld [vmem:[%s3170_s7 + $0xf0] sm:$0xff]  ;;  %vm1897_vm4 = vcmask 523264  }
 0x899   :  { %v1343_v9 = vmul.f32 %v2809_v24, %v1342_v8  ;;  %1540 = vmatpush.msrb.mxu2 %v2072_v26  ;;  %v2071_v24 = vld [vmem:[%s3166_s3 + $0xf0] sm:$0xff]  ;;  %v2097_v3 = vld [vmem:[%s3170_s7 + $0xf8] sm:$0xff]  ;;  %s1960_s3 = sshll.u32 %s2255_s17, 4  ;;  %s1961_s3 = int_to_ptr.vmem [resolvable:$true] %s1960_s3 }
 0x89a   :  { %2067 = vmatmul.msk.f32.vlgmr.msrb.gmra.mxu1 %vm343_vm2, %v1358_v46  ;;  %1633 = vmatpush.msra.mxu3 %v2076_v57  ;;  %v2095_v46 = vld [vmem:[%s3170_s7 + $0xe8] sm:$0xff]  ;;  %v2093_v14 = vld [vmem:[%s3170_s7 + $0xd8] sm:$0xff]  ;;  %v2092_v26 = vld [vmem:[%s3170_s7 + $0xd0] sm:$0xff] }
 0x89b   :  { %2065 = vmatmul.msk.f32.gmra.mxu0 %vm343_vm2, %v1343_v9  ;;  %1541 = vmatpush.msrb.mxu2 %v2071_v24  ;;  %v2094_v9 = vld [vmem:[%s3170_s7 + $0xe0] sm:$0xff] }
 0x89c   :  { %1634 = vmatpush.msra.mxu3 %v2075_v62  ;;  %1662 = vmatpush.msrb.mxu0 %v2097_v3 }
 0x89d   :  { %1542 = vmatpush.msrb.mxu2 %v2070_v55  ;;  %v2091_v55 = vld [vmem:[%s3170_s7 + $0xc8] sm:$0xff] }
 0x89e   :  { %1663 = vmatpush.msrb.mxu0 %v2096_v4 }
 0x89f   :  { %1543 = vmatpush.msrb.mxu2 %v2069_v22 }
 0x8a0   :  { %1664 = vmatpush.msrb.mxu0 %v2095_v46 }
 0x8a2   :  { %2068 = vmatmul.msk.f32.gmra.mxu1 %vm343_vm2, %v1373_v16  ;;  %1665 = vmatpush.msrb.mxu0 %v2094_v9 }
 0x8a4   :  { %1666 = vmatpush.msrb.mxu0 %v2093_v14  ;;  %v1739_v14 = vld [vmem:[%s3171_s8 + $0x10] sm:$0xff] }
 0x8a6   :  { %1667 = vmatpush.msrb.mxu0 %v2092_v26  ;;  %v2100_v26 = vld [vmem:[%s3171_s8 + $0x30] sm:$0xff] }
 0x8a8   :  { %1668 = vmatpush.msrb.mxu0 %v2091_v55  ;;  %v2106_v55 = vld [vmem:[%s3171_s8 + $0x50] sm:$0xff] }
 0x90b   :  { %v1432_v21 = vpop.f32.mrf.mxu3 }
 0x90c   :  { %v1400_v19 = vpop.f32.mrf.mxu2  ;;  %v1503_v25 = vsel %vm63_vm0, %v1432_v21, 0.0 }
 0x90d   :  { %v1464_v18 = vpop.f32.mrf.mxu0  ;;  %v1502_v15 = vsel %vm63_vm0, %v1400_v19, 0.0 }
 0x90e   :  { %v1504_v56 = vadd.f32 %v1503_v25, %v1502_v15  ;;  %v1505_v28 = vsel %vm63_vm0, %v1464_v18, 0.0  ;;  %v2090_v18 = vld [vmem:[%s3170_s7 + $0xc0] sm:$0xff]  ;;  %v2089_v15 = vld [vmem:[%s3170_s7 + $0xb8] sm:$0xff] }
 0x90f   :  { %1669 = vmatpush.msrb.mxu0 %v2090_v18  ;;  %v2099_v18 = vld [vmem:[%s3171_s8 + $0x28] sm:$0xff] }
 0x910   :  { %v1506_v29 = vadd.f32 %v1505_v28, %v1504_v56  ;;  %v1597_v28 = vperm.slane %v2736_v33, 4 }
 0x911   :  { %1670 = vmatpush.msrb.mxu0 %v2089_v15  ;;  %v2117_v15 = vld [vmem:[%s3171_s8 + $0x98] sm:$0xff] }
 0x915   :  { %v1403_v30 = vpop.f32.mrf.mxu2  ;;  %v1435_v61 = vpop.f32.mrf.mxu3 }
 0x916   :  { %v1509_v35 = vsel %vm673_vm12, %v1403_v30, 0.0  ;;  %v1510_v36 = vsel %vm673_vm12, %v1435_v61, 0.0 }
 0x917   :  { %v1496_v23 = vpop.f32.mrf.mxu1  ;;  %v1511_v41 = vadd.f32 %v1510_v36, %v1509_v35  ;;  %v2087_v35 = vld [vmem:[%s3170_s7 + $0xa8] sm:$0xff] }
 0x918   :  { %v1507_v7 = vsel %vm63_vm0, %v1496_v23, 0.0  ;;  %v1467_v37 = vpop.f32.mrf.mxu0 }
 0x919   :  { %v1508_v40 = vadd.f32 %v1507_v7, %v1506_v29  ;;  %v1512_v34 = vsel %vm673_vm12, %v1467_v37, 0.0  ;;  %v2088_v29 = vld [vmem:[%s3170_s7 + $0xb0] sm:$0xff]  ;;  %v1600_v7 = vperm.slane %v2736_v33, 5 }
 0x91a   :  { %v1513_v58 = vadd.f32 %v1512_v34, %v1511_v41  ;;  %1671 = vmatpush.msrb.mxu0 %v2088_v29  ;;  %v2116_v29 = vld [vmem:[%s3171_s8 + $0x90] sm:$0xff] }
 0x91b   :  { %2073 = vmatmul.msk.f32.vlgmr.msrb.gmra.mxu2 %vm63_vm0, %v1508_v40  ;;  %v2086_v40 = vld [vmem:[%s3170_s7 + $0xa0] sm:$0xff] }
 0x91c   :  { %1672 = vmatpush.msrb.mxu0 %v2087_v35  ;;  %v2110_v35 = vld [vmem:[%s3171_s8 + $0x68] sm:$0xff] }
 0x91e   :  { %1673 = vmatpush.msrb.mxu0 %v2086_v40  ;;  %v2114_v40 = vld [vmem:[%s3171_s8 + $0x80] sm:$0xff] }
 0x91f   :  { %v1499_v63 = vpop.f32.mrf.mxu1 }
 0x920   :  { %v1514_v38 = vsel %vm673_vm12, %v1499_v63, 0.0 }
 0x921   :  { %v1515_v42 = vadd.f32 %v1514_v38, %v1513_v58  ;;  %v2085_v58 = vld [vmem:[%s3170_s7 + $0x98] sm:$0xff] }
 0x922   :  { %1674 = vmatpush.msrb.mxu0 %v2085_v58 }
 0x923   :  { %2074 = vmatmul.msk.f32.gmra.mxu2 %vm63_vm0, %v1515_v42 }
 0x99e   :  { %v1545_v44 = vpop.f32.mrf.mxu2 }
 0x99f   :  { %v1546_v10 = vadd.f32 %v1545_v44, %v1521_v43  ;;  %v2084_v44 = vld [vmem:[%s3170_s7 + $0x90] sm:$0xff] }
 0x9a0   :  { %1675 = vmatpush.msrb.mxu0 %v2084_v44 }
 0x9a1   :  { %v1551_v45 = vadd.f32 %v1546_v10, %v2716_v27  ;;  %v2083_v10 = vld [vmem:[%s3170_s7 + $0x88] sm:$0xff] }
 0x9a2   :  { %1676 = vmatpush.msrb.mxu0 %v2083_v10 }
 0x9a3   :  { %v1553_v47 = vsel %vm63_vm0, %v1551_v45, 0.0 }
 0x9a4   :  { %1554 = vadd.xlane.f32.xlu1 %v1553_v47  ;;  %v2133_v47 = vld [vmem:[%s3169_s6 + $0x1] ss:$0 sm:$0xff] }
 0x9a6   :  { %v1548_v1 = vpop.f32.mrf.mxu2 }
 0x9a7   :  { %v1549_v39 = vadd.f32 %v1548_v1, %v1521_v43 }
 0x9a9   :  { %v1552_v48 = vadd.f32 %v1549_v39, %v2725_v31 }
 0x9ab   :  { %v1556_v59 = vsel %vm673_vm12, %v1552_v48, 0.0 }
 0x9ac   :  { %1557 = vadd.xlane.f32.xlu2 %v1556_v59 }
 0xa17   :  { %v1555_v49 = vpop.xlane.xlu1 %1554 }
 0xa18   :  { %v1559_v50 = vmul.f32 %v1555_v49, %v2582_v32 }
 0xa1a   :  { %v1561_v51 = vsub.f32 %v1551_v45, %v1559_v50  ;;  %v2082_v45 = vld [vmem:[%s3170_s7 + $0x80] sm:$0xff] }
 0xa1b   :  { %1677 = vmatpush.msrb.mxu0 %v2082_v45 }
 0xa1c   :  { %v1563_v2 = vmul.f32 %v1561_v51, %v1561_v51 }
 0xa1e   :  { %v1565_v13 = vsel %vm63_vm0, %v1563_v2, 0.0 }
 0xa1f   :  { %1566 = vadd.xlane.f32.xlu0 %v1565_v13  ;;  %v1558_v52 = vpop.xlane.xlu2 %1557 }
 0xa20   :  { %v1560_v27 = vmul.f32 %v1558_v52, %v2582_v32 }
 0xa22   :  { %v2950_v5 = vsub.f32 %v1552_v48, %v1560_v27 }
 0xa24   :  { %v1564_v53 = vmul.f32 %v2950_v5, %v2950_v5 }
 0xa26   :  { %v1568_v31 = vsel %vm673_vm12, %v1564_v53, 0.0 }
 0xa27   :  { %1569 = vadd.xlane.f32.xlu1 %v1568_v31 }
 0xa92   :  { %v1567_v17 = vpop.xlane.xlu0 %1566 }
 0xa93   :  { %v1571_v60 = vmul.f32 %v1567_v17, %v2582_v32 }
 0xa95   :  { %v1573_v0 = vadd.f32 1e-05, %v1571_v60 }
 0xa97   :  { %2212 = vrsqrt.f32 %v1573_v0  ;;  %vm1581_vm7 = vweird.f32 %v1573_v0 }
 0xa9a   :  { %v1570_v6 = vpop.xlane.xlu1 %1569 }
 0xa9b   :  { %v1572_v8 = vmul.f32 %v1570_v6, %v2582_v32 }
 0xa9d   :  { %v2213_v11 = vpop.eup %2212  ;;  %v1574_v12 = vadd.f32 1e-05, %v1572_v8  ;;  %v1740_v8 = vld [vmem:[%s3171_s8 + $0x18] sm:$0xff] }
 0xa9e   :  { %v1576_v16 = vmul.f32 %v2213_v11, %v1573_v0  ;;  %vm1582_vm2 = vweird.f32 %v2213_v11  ;;  %1784 = vmatpush.msra.mxu2 %v1740_v8 }
 0xa9f   :  { %2214 = vrsqrt.f32 %v1574_v12  ;;  %vm1583_vm8 = vmor %vm1581_vm7, %vm1582_vm2  ;;  %vm1591_vm10 = vweird.f32 %v1574_v12 }
 0xaa0   :  { %v1577_v24 = vmul.f32 %v2213_v11, %v1576_v16  ;;  %v2107_v16 = vld [vmem:[%s3171_s8 + $0x58] sm:$0xff]  ;;  %1785 = vmatpush.msra.mxu2 %v1739_v14  ;;  %v2135_v14 = vld [vmem:[%s3172_s9] ss:$0 sm:$0xff] }
 0xaa1   :  { %1812 = vmatpush.msrb.mxu3 %v2107_v16 }
 0xaa2   :  { %v1578_v22 = vmul.f32 0.5, %v1577_v24  ;;  %v1738_v24 = vld [vmem:[%s3171_s8 + $0x8] sm:$0xff] }
 0xaa3   :  { %1786 = vmatpush.msra.mxu2 %v1738_v24  ;;  %1813 = vmatpush.msrb.mxu3 %v2106_v55 }
 0xaa4   :  { %v1579_v19 = vsub.f32 1.5, %v1578_v22 }
 0xaa5   :  { %v2215_v21 = vpop.eup %2214 }
 0xaa6   :  { %v1580_v25 = vmul.f32 %v2213_v11, %v1579_v19  ;;  %v1586_v56 = vmul.f32 %v2215_v21, %v1574_v12  ;;  %vm1592_vm9 = vweird.f32 %v2215_v21  ;;  %v2101_v12 = vld [vmem:[%s3171_s8 + $0x38] sm:$0xff]  ;;  %v1737_v19 = vld [vmem:[%s3171_s8] sm:$0xff] }
 0xaa7   :  { %vm1593_vm11 = vmor %vm1591_vm10, %vm1592_vm9  ;;  %1762 = vmatpush.msra.mxu1 %v2101_v12  ;;  %1787 = vmatpush.msra.mxu2 %v1737_v19  ;;  %v1922_v19 = vld [vmem:[%s3175_s12] sm:$0xff] }
 0xaa8   :  { %v1584_v23 = vsel %vm1583_vm8, %v2213_v11, %v1580_v25  ;;  %v1587_v30 = vmul.f32 %v2215_v21, %v1586_v56  ;;  %v2098_v25 = vld [vmem:[%s3171_s8 + $0x20] sm:$0xff] }
 0xaa9   :  { %v1595_v61 = vmul.f32 %v1584_v23, %v1561_v51  ;;  %v2134_v51 = vld [vmem:[%s3167_s4 + $0x18] ss:$0 sm:$0xff]  ;;  %1763 = vmatpush.msra.mxu1 %v2100_v26  ;;  %v2104_v56 = vld [vmem:[%s3171_s8 + $0x40] sm:$0xff]  ;;  %1870 = vmatpush.msrb.mxu2 %v2117_v15 }
 0xaaa   :  { %v1588_v36 = vmul.f32 0.5, %v1587_v30  ;;  %v2111_v30 = vld [vmem:[%s3171_s8 + $0x70] sm:$0xff] }
 0xaab   :  { %v1598_v37 = vmul.f32 %v1597_v28, %v1595_v61  ;;  %1764 = vmatpush.msra.mxu1 %v2099_v18  ;;  %1871 = vmatpush.msrb.mxu2 %v2116_v29  ;;  %v1923_v18 = vld [vmem:[%s3175_s12 + $0x8] sm:$0xff] }
 0xaac   :  { %v1589_v41 = vsub.f32 1.5, %v1588_v36 }
 0xaad   :  { %v1601_v34 = vadd.f32 %v1600_v7, %v1598_v37  ;;  %1765 = vmatpush.msra.mxu1 %v2098_v25 }
 0xaae   :  { %v1590_v33 = vmul.f32 %v2215_v21, %v1589_v41 }
 0xaaf   :  { %2080 = vmatmul.msk.f32.vlgmr.msra.gmra.mxu3 %vm63_vm0, %v1601_v34 }
 0xab0   :  { %v1594_v63 = vsel %vm1593_vm11, %v2215_v21, %v1590_v33  ;;  %v2105_v21 = vld [vmem:[%s3171_s8 + $0x48] sm:$0xff] }
 0xab1   :  { %v1596_v38 = vmul.f32 %v1594_v63, %v2950_v5  ;;  %1814 = vmatpush.msrb.mxu3 %v2105_v21  ;;  %v2136_v21 = vld [vmem:[%s3174_s11] ss:$0 sm:$0xff] }
 0xab3   :  { %v1599_v42 = vmul.f32 %v1597_v28, %v1596_v38  ;;  %v2112_v28 = vld [vmem:[%s3171_s8 + $0x78] sm:$0xff]  ;;  %1815 = vmatpush.msrb.mxu3 %v2104_v56 }
 0xab4   :  { %1841 = vmatpush.msrb.mxu1 %v2112_v28  ;;  %v2137_v28 = vld [vmem:[%s3176_s13] ss:$0 sm:$0xff] }
 0xab5   :  { %v1602_v43 = vadd.f32 %v1600_v7, %v1599_v42  ;;  %v2115_v7 = vld [vmem:[%s3171_s8 + $0x88] sm:$0xff] }
 0xab6   :  { %1842 = vmatpush.msrb.mxu1 %v2111_v30  ;;  %1872 = vmatpush.msrb.mxu2 %v2115_v7 }
 0xab7   :  { %2081 = vmatmul.msk.f32.gmra.mxu3 %vm63_vm0, %v1602_v43 }
 0xab8   :  { %1843 = vmatpush.msrb.mxu1 %v2110_v35  ;;  %1873 = vmatpush.msrb.mxu2 %v2114_v40 }
 0xb32   :  { %v1636_v1 = vpop.f32.mrf.mxu3 }
 0xb33   :  { %v1637_v39 = vadd.f32 %v2133_v47, %v1636_v1 }
 0xb35   :  { %v1642_v48 = vmax.f32 %v1637_v39, 0.0 }
 0xb37   :  { %1678 = vmatmul.f32.vlgmr.msrb.gmra.mxu0 %v1642_v48 }
 0xb3a   :  { %v1639_v59 = vpop.f32.mrf.mxu3 }
 0xb3b   :  { %v1640_v49 = vadd.f32 %v2133_v47, %v1639_v59 }
 0xb3d   :  { %v1643_v50 = vmax.f32 %v1640_v49, 0.0 }
 0xb3f   :  { %1681 = vmatmul.f32.gmra.mxu0 %v1643_v50 }
 0xbb4   :  { %v1679_v2 = vpop.f32.mrf.mxu0 }
 0xbb5   :  { %v1680_v13 = vadd.f32 %v2134_v51, %v1679_v2 }
 0xbb7   :  { %v1685_v52 = vadd.f32 %v1680_v13, %v1601_v34 }
 0xbb9   :  { %v1687_v27 = vsel %vm63_vm0, %v1685_v52, 0.0 }
 0xbba   :  { %1688 = vadd.xlane.f32.xlu2 %v1687_v27 }
 0xbbc   :  { %v1682_v5 = vpop.f32.mrf.mxu0 }
 0xbbd   :  { %v1683_v53 = vadd.f32 %v2134_v51, %v1682_v5 }
 0xbbf   :  { %v1686_v31 = vadd.f32 %v1683_v53, %v1602_v43  ;;  %v2227_v43 = vld [vmem:[%s3167_s4 + $0x10] sm:$0xff] }
 0xbc0   :  { %v1731_v44 = vperm.slane %v2227_v43, 6  ;;  %v1734_v1 = vperm.slane %v2227_v43, 7 }
 0xbc1   :  { %v1690_v54 = vsel %vm673_vm12, %v1686_v31, 0.0 }
 0xbc2   :  { %1691 = vadd.xlane.f32.xlu0 %v1690_v54  ;;  %v1891_v54 = vld [vmem:[%s3173_s10 + $0x30] sm:$0xff] }
 0xc2d   :  { %v1689_v20 = vpop.xlane.xlu2 %1688 }
 0xc2e   :  { %v1693_v17 = vmul.f32 %v1689_v20, %v2582_v32  ;;  %v1890_v20 = vld [vmem:[%s3173_s10 + $0x28] sm:$0xff] }
 0xc30   :  { %v3031_v57 = vsub.f32 %v1685_v52, %v1693_v17  ;;  %v1889_v17 = vld [vmem:[%s3173_s10 + $0x20] sm:$0xff] }
 0xc32   :  { %v1697_v60 = vmul.f32 %v3031_v57, %v3031_v57 }
 0xc34   :  { %v1699_v62 = vsel %vm63_vm0, %v1697_v60, 0.0  ;;  %v1887_v60 = vld [vmem:[%s3173_s10 + $0x10] sm:$0xff] }
 0xc35   :  { %v1692_v0 = vpop.xlane.xlu0 %1691  ;;  %1700 = vadd.xlane.f32.xlu1 %v1699_v62  ;;  %v1886_v62 = vld [vmem:[%s3173_s10 + $0x8] sm:$0xff] }
 0xc36   :  { %v1694_v3 = vmul.f32 %v1692_v0, %v2582_v32  ;;  %v1925_v0 = vld [vmem:[%s3175_s12 + $0x18] sm:$0xff] }
 0xc38   :  { %v3037_v4 = vsub.f32 %v1686_v31, %v1694_v3  ;;  %v1892_v31 = vld [vmem:[%s3173_s10 + $0x38] sm:$0xff]  ;;  %v1885_v3 = vld [vmem:[%s3173_s10] sm:$0xff] }
 0xc39   :  { %1909 = vmatpush.msra.mxu3 %v1892_v31 }
 0xc3a   :  { %v1698_v46 = vmul.f32 %v3037_v4, %v3037_v4 }
 0xc3b   :  { %1910 = vmatpush.msra.mxu3 %v1891_v54 }
 0xc3c   :  { %v1702_v6 = vsel %vm673_vm12, %v1698_v46, 0.0 }
 0xc3d   :  { %1703 = vadd.xlane.f32.xlu2 %v1702_v6  ;;  %1911 = vmatpush.msra.mxu3 %v1890_v20 }
 0xc3f   :  { %1912 = vmatpush.msra.mxu3 %v1889_v17 }
 0xca8   :  { %v1701_v9 = vpop.xlane.xlu1 %1700 }
 0xca9   :  { %v1705_v11 = vmul.f32 %v1701_v9, %v2582_v32 }
 0xcab   :  { %v1707_v22 = vadd.f32 1e-05, %v1705_v11 }
 0xcad   :  { %2216 = vrsqrt.f32 %v1707_v22  ;;  %vm1715_vm13 = vweird.f32 %v1707_v22 }
 0xcb0   :  { %v1704_v23 = vpop.xlane.xlu2 %1703 }
 0xcb1   :  { %v1706_v61 = vmul.f32 %v1704_v23, %v2582_v32  ;;  %v2109_v32 = vld [vmem:[%s3171_s8 + $0x60] sm:$0xff] }
 0xcb2   :  { %1844 = vmatpush.msrb.mxu1 %v2109_v32 }
 0xcb3   :  { %v2217_v36 = vpop.eup %2216  ;;  %v1708_v37 = vadd.f32 1e-05, %v1706_v61 }
 0xcb4   :  { %v1710_v41 = vmul.f32 %v2217_v36, %v1707_v22  ;;  %vm1716_vm12 = vweird.f32 %v2217_v36  ;;  %v1924_v22 = vld [vmem:[%s3175_s12 + $0x10] sm:$0xff]  ;;  %s1962_s12 = sshll.u32 %s3177_s14, 4  ;;  %s1963_s12 = int_to_ptr.hbm [resolvable:$true] %s1962_s12 }
 0xcb5   :  { %2218 = vrsqrt.f32 %v1708_v37  ;;  %vm1717_vm14 = vmor %vm1715_vm13, %vm1716_vm12  ;;  %vm1725_vm3 = vweird.f32 %v1708_v37 }
 0xcb6   :  { %v1711_v34 = vmul.f32 %v2217_v36, %v1710_v41 }
 0xcb8   :  { %v1712_v58 = vmul.f32 0.5, %v1711_v34 }
 0xcba   :  { %v1713_v33 = vsub.f32 1.5, %v1712_v58 }
 0xcbb   :  { %v2219_v63 = vpop.eup %2218 }
 0xcbc   :  { %v1714_v38 = vmul.f32 %v2217_v36, %v1713_v33  ;;  %v1720_v42 = vmul.f32 %v2219_v63, %v1708_v37  ;;  %vm1726_vm1 = vweird.f32 %v2219_v63 }
 0xcbd   :  { %vm1727_vm15 = vmor %vm1725_vm3, %vm1726_vm1 }
 0xcbe   :  { %v1718_v10 = vsel %vm1717_vm14, %v2217_v36, %v1714_v38  ;;  %v1721_v45 = vmul.f32 %v2219_v63, %v1720_v42 }
 0xcbf   :  { %v1729_v47 = vmul.f32 %v1718_v10, %v3031_v57  ;;  %v1888_v57 = vld [vmem:[%s3173_s10 + $0x18] sm:$0xff] }
 0xcc0   :  { %v1722_v39 = vmul.f32 0.5, %v1721_v45  ;;  %1913 = vmatpush.msra.mxu3 %v1888_v57 }
 0xcc1   :  { %v1732_v48 = vmul.f32 %v1731_v44, %v1729_v47 }
 0xcc2   :  { %v1723_v59 = vsub.f32 1.5, %v1722_v39  ;;  %1914 = vmatpush.msra.mxu3 %v1887_v60 }
 0xcc3   :  { %v1735_v49 = vadd.f32 %v1734_v1, %v1732_v48 }
 0xcc4   :  { %v1724_v50 = vmul.f32 %v2219_v63, %v1723_v59  ;;  %1915 = vmatpush.msra.mxu3 %v1886_v62 }
 0xcc5   :  { %2103 = vmatmul.msk.f32.vlgmr.msra.gmra.mxu2 %vm63_vm0, %v1735_v49  ;;  %v1747_v51 = vrot.slane %v1735_v49, 2  ;;  %v1797_v2 = vrot.slane %v1735_v49, 4  ;;  %v1826_v53 = vrot.slane %v1735_v49, 6 }
 0xcc6   :  { %v1728_v13 = vsel %vm1727_vm15, %v2219_v63, %v1724_v50  ;;  %1916 = vmatpush.msra.mxu3 %v1885_v3 }
 0xcc7   :  { %v1730_v52 = vmul.f32 %v1728_v13, %v3037_v4  ;;  %2102 = vmatmul.msk.f32.vlgmr.msra.gmra.mxu1 %vm63_vm0, %v1747_v51  ;;  %2108 = vmatmul.msk.f32.vlgmr.msrb.gmra.mxu3 %vm63_vm0, %v1797_v2 }
 0xcc8   :  { %1945 = vmatpush.msra.mxu1 %v1925_v0 }
 0xcc9   :  { %v1733_v27 = vmul.f32 %v1731_v44, %v1730_v52 }
 0xcca   :  { %1946 = vmatpush.msra.mxu1 %v1924_v22 }
 0xccb   :  { %v1736_v5 = vadd.f32 %v1734_v1, %v1733_v27 }
 0xccc   :  { %1947 = vmatpush.msra.mxu1 %v1923_v18 }
 0xccd   :  { %2118 = vmatmul.msk.f32.vlgmr.msrb.gmra.mxu2 %vm63_vm0, %v1736_v5 }
 0xcce   :  { %1948 = vmatpush.msra.mxu1 %v1922_v19 }
 0xccf   :  { %2113 = vmatmul.msk.f32.vlgmr.msrb.gmra.mxu1 %vm63_vm0, %v1826_v53 }
 0xd44   :  { %v1767_v4 = vpop.f32.mrf.mxu1 }
 0xd48   :  { %v1789_v46 = vpop.f32.mrf.mxu2 }
 0xd49   :  { %v1790_v6 = vadd.f32 %v1789_v46, %v1767_v4 }
 0xd4a   :  { %v1817_v8 = vpop.f32.mrf.mxu3 }
 0xd4b   :  { %v1820_v9 = vadd.f32 %v1817_v8, %v1790_v6 }
 0xd4c   :  { %v1846_v11 = vpop.f32.mrf.mxu1 }
 0xd4d   :  { %v1849_v12 = vadd.f32 %v1846_v11, %v1820_v9 }
 0xd50   :  { %v1875_v16 = vpop.f32.mrf.mxu2 }
 0xd51   :  { %v1878_v26 = vadd.f32 %v1875_v16, %v1849_v12 }
 0xd53   :  { %v1883_v24 = vadd.f32 %v2135_v14, %v1878_v26 }
 0xd55   :  { %v1884_v55 = vmax.f32 %v1883_v24, 0.0 }
 0xd57   :  { %2119 = vmatmul.msk.f32.vlgmr.msra.gmra.mxu3 %vm1897_vm4, %v1884_v55 }
 0xdda   :  { %v1918_v15 = vpop.f32.mrf.mxu3 }
 0xddb   :  { %v1919_v25 = vadd.f32 %v2136_v21, %v1918_v15 }
 0xddd   :  { %v1921_v56 = vmax.f32 %v1919_v25, 0.0 }
 0xddf   :  { %2120 = vmatmul.msk.f32.vlgmr.msra.gmra.mxu1 %vm63_vm0, %v1921_v56 }
 0xe5c   :  { %v1950_v29 = vpop.f32.mrf.mxu1 }
 0xe5d   :  { %v1951_v23 = vadd.f32 %v2137_v28, %v1950_v29 }
 0xe5f   :  { %1954 = vst.msk [vmem:[#allocation2] sm:$0x3] %vm1953_vm5, %v1951_v23 }
 0xe60   :  { %1965 = dma.vmem_to_hbm [thread:$0]  %s1961_s3, 32, %s1963_s12, [#allocation3]  }
 0xe61   :  { %2252 = dma.done.wait [#allocation3], 32  }
 0xe62   :  { %2253 = vsyncadd [#allocation3], 4294967264 }
 0xe63   :  { %1970 = vsyncpa [#allocation3], 1 }

</bundles_post_ra>
